<compile_context>
chip_gen: v7x
topology: tpu7x:2x2x1
jax: 0.10.0
libtpu: 0.0.40
codegen_flags: <defaults>
</compile_context>

<pallas_src>
import jax
import jax.numpy as jnp
from jax.experimental import pallas as pl
from jax.experimental.pallas import tpu as pltpu

PAD = 128  # lane width


def _round_up(n, m):
    return ((n + m - 1) // m) * m


def _dqn_kernel(x_ref, w1_ref, b1_ref, w2_ref, b2_ref, w3_ref, b3_ref, o_ref, xpad_ref):
    in_dim = x_ref.shape[1]
    # Lane-pad the narrow (TB, in_dim) f32 input tile into a lane-dense bf16 (TB, 128)
    # VMEM scratch. Zero the scratch every step: scratch is per-core, so a program_id()==0
    # guard would leave the second TensorCore's padding lanes uninitialized on v7x.
    xpad_ref[...] = jnp.zeros_like(xpad_ref)
    xpad_ref[:, :in_dim] = x_ref[...].astype(jnp.bfloat16)
    x = xpad_ref[...]                                                     # bf16 (TB, 128)

    h1 = jnp.dot(x, w1_ref[...], preferred_element_type=jnp.float32) + b1_ref[...]
    h1 = jnp.maximum(h1, 0.0).astype(jnp.bfloat16)                        # f32 ReLU -> bf16 operand
    h2 = jnp.dot(h1, w2_ref[...], preferred_element_type=jnp.float32) + b2_ref[...]
    h2 = jnp.maximum(h2, 0.0).astype(jnp.bfloat16)
    out = jnp.dot(h2, w3_ref[...], preferred_element_type=jnp.float32) + b3_ref[...]
    o_ref[...] = out.astype(o_ref.dtype)                                  # bf16 lane-dense store


def dqn_forward(x, padded_params, output_dim, *, tb=None):
    """x: (B, input_dim) f32. padded_params: lane-dense bf16 weights + f32 (1, N) biases."""
    B, in_dim = x.shape
    w1, b1 = padded_params["w1"], padded_params["b1"]
    w2, b2 = padded_params["w2"], padded_params["b2"]
    w3, b3 = padded_params["w3"], padded_params["b3"]
    in_pad, hid_pad = w1.shape
    out_pad = w3.shape[1]

    if tb is None:
        # Fat batch tiles amortize the ~600-cycle/step overhead; keep >=2 grid steps when
        # possible so v7x can split the parallel batch axis over both TensorCores.
        tb = min(512, max(8, _round_up(pl.cdiv(B, 2), 8)))
    b_pad = _round_up(max(B, 1), tb)

    # Batch-pad only: x stays (b_pad, in_dim) f32 in HBM (no lane/dtype inflation); feature
    # padding to 128 lanes happens in VMEM inside the kernel.
    xp = x if b_pad == B else jnp.zeros((b_pad, in_dim), x.dtype).at[:B].set(x)

    grid = (b_pad // tb,)

    def build(single_buffer_weights):
        def wspec(shape):
            if single_buffer_weights:
                # Constant index_map -> block never changes; single-buffer it.
                return pl.BlockSpec(shape, lambda i: (0, 0), pipeline_mode=pl.Buffered(1))
            return pl.BlockSpec(shape, lambda i: (0, 0))

        return pl.pallas_call(
            _dqn_kernel,
            out_shape=jax.ShapeDtypeStruct((b_pad, out_pad), jnp.bfloat16),
            grid_spec=pltpu.PrefetchScalarGridSpec(
                num_scalar_prefetch=0,
                grid=grid,
                in_specs=[
                    pl.BlockSpec((tb, in_dim), lambda i: (i, 0)),      # x tile, pipelined
                    wspec((in_pad, hid_pad)),                          # weights resident
                    wspec((1, hid_pad)),
                    wspec((hid_pad, hid_pad)),
                    wspec((1, hid_pad)),
                    wspec((hid_pad, out_pad)),
                    wspec((1, out_pad)),
                ],
                out_specs=pl.BlockSpec((tb, out_pad), lambda i: (i, 0)),
                scratch_shapes=[pltpu.VMEM((tb, in_pad), jnp.bfloat16)],  # lane-padded x
            ),
            compiler_params=pltpu.CompilerParams(
                dimension_semantics=("parallel",)),  # v7x: shard batch over both TCs
        )

    args = (xp, w1, b1, w2, b2, w3, b3)
    try:
        out = build(True)(*args)
    except Exception:
        # Fallback if this JAX build rejects pipeline_mode/Buffered(1) on BlockSpec.
        out = build(False)(*args)
    return out[:B, :output_dim].astype(jnp.float32)


def init_params(key, input_dim=5, hidden_dim=24, output_dim=3):
    """PyTorch-default Linear init (uniform +/- 1/sqrt(fan_in)) at the true shapes (f32)."""
    ks = jax.random.split(key, 6)

    def linear(kw, kb, fan_in, fan_out):
        bound = 1.0 / jnp.sqrt(jnp.float32(fan_in))
        w = jax.random.uniform(kw, (fan_in, fan_out), jnp.float32, -bound, bound)
        b = jax.random.uniform(kb, (fan_out,), jnp.float32, -bound, bound)
        return w, b

    w1, b1 = linear(ks[0], ks[1], input_dim, hidden_dim)
    w2, b2 = linear(ks[2], ks[3], hidden_dim, hidden_dim)
    w3, b3 = linear(ks[4], ks[5], hidden_dim, output_dim)
    return {"w1": w1, "b1": b1, "w2": w2, "b2": b2, "w3": w3, "b3": b3}


def pad_params(p):
    """Zero-pad every feature dim to a multiple of 128; weights -> bf16, biases -> f32 (1, N)."""
    def pad_w(w):
        fi, fo = w.shape
        wp = jnp.zeros((_round_up(fi, PAD), _round_up(fo, PAD)), jnp.float32)
        return wp.at[:fi, :fo].set(w).astype(jnp.bfloat16)

    def pad_b(b):
        (fo,) = b.shape
        bp = jnp.zeros((1, _round_up(fo, PAD)), jnp.float32)
        return bp.at[0, :fo].set(b)

    return {"w1": pad_w(p["w1"]), "b1": pad_b(p["b1"]),
            "w2": pad_w(p["w2"]), "b2": pad_b(p["b2"]),
            "w3": pad_w(p["w3"]), "b3": pad_b(p["b3"])}


def dqn_reference_bf16(x, p):
    """Mirrors kernel numerics (bf16-rounded operands, f32 accumulate / bias / ReLU),
    without the final bf16 output rounding (tolerance below absorbs it)."""
    r = lambda a: a.astype(jnp.bfloat16).astype(jnp.float32)
    h1 = jnp.maximum(r(x) @ r(p["w1"]) + p["b1"][None, :], 0.0)
    h2 = jnp.maximum(r(h1) @ r(p["w2"]) + p["b2"][None, :], 0.0)
    return r(h2) @ r(p["w3"]) + p["b3"][None, :]


if __name__ == "__main__":
    key = jax.random.PRNGKey(0)
    kx, kp = jax.random.split(key)
    B, input_dim, hidden_dim, output_dim = 256, 5, 24, 3

    x = jax.random.normal(kx, (B, input_dim), jnp.float32)
    params = init_params(kp, input_dim, hidden_dim, output_dim)
    padded = pad_params(params)

    out = dqn_forward(x, padded, output_dim)   # default tb -> 128 here (2 grid steps)
    out = jax.block_until_ready(out)

    ref = dqn_reference_bf16(x, params)
    assert out.shape == (B, output_dim)
    # Tolerance covers the bf16 output writeback (~2^-8 relative) plus accumulation-order noise.
    assert jnp.allclose(out, ref, atol=5e-3, rtol=1e-2), "mismatch vs reference"
    print("KERNEL_OK")
</pallas_src>

<mosaic_0001>
module attributes {stable_mosaic.version = 11 : i64} {
  func.func @_dqn_kernel(%arg0: i32, %arg1: memref<128x5xf32, #tpu.memory_space<vmem>>, %arg2: memref<128x128xbf16, #tpu.memory_space<vmem>>, %arg3: memref<1x128xf32, #tpu.memory_space<vmem>>, %arg4: memref<128x128xbf16, #tpu.memory_space<vmem>>, %arg5: memref<1x128xf32, #tpu.memory_space<vmem>>, %arg6: memref<128x128xbf16, #tpu.memory_space<vmem>>, %arg7: memref<1x128xf32, #tpu.memory_space<vmem>>, %arg8: memref<128x128xbf16, #tpu.memory_space<vmem>>, %arg9: memref<128x128xbf16, #tpu.memory_space<vmem>>) attributes {dimension_semantics = [#tpu.dimension_semantics<parallel>], iteration_bounds = array<i64: 2>, scalar_prefetch = 0 : i64, scratch_operands = 1 : i64, tpu.core_type = #tpu.core_type<tc>, window_params = [{transform_indices = @transform_0, window_bounds = array<i64: 128, 5>}, {pipeline_mode = #tpu.pipeline_mode<synchronous>, transform_indices = @transform_1, window_bounds = array<i64: 128, 128>}, {pipeline_mode = #tpu.pipeline_mode<synchronous>, transform_indices = @transform_2, window_bounds = array<i64: 1, 128>}, {pipeline_mode = #tpu.pipeline_mode<synchronous>, transform_indices = @transform_3, window_bounds = array<i64: 128, 128>}, {pipeline_mode = #tpu.pipeline_mode<synchronous>, transform_indices = @transform_4, window_bounds = array<i64: 1, 128>}, {pipeline_mode = #tpu.pipeline_mode<synchronous>, transform_indices = @transform_5, window_bounds = array<i64: 128, 128>}, {pipeline_mode = #tpu.pipeline_mode<synchronous>, transform_indices = @transform_6, window_bounds = array<i64: 1, 128>}, {transform_indices = @transform_7, window_bounds = array<i64: 128, 128>}]} {
    %cst = arith.constant 0.000000e+00 : bf16
    %0 = vector.broadcast %cst : bf16 to vector<128x128xbf16>
    %c0 = arith.constant 0 : index
    %c0_0 = arith.constant 0 : index
    %1 = vector.load %arg9[%c0, %c0_0] : memref<128x128xbf16, #tpu.memory_space<vmem>>, vector<128x128xbf16>
    tpu.vector_store %arg9[%c0, %c0_0], %0 {strides = array<i32>} : memref<128x128xbf16, #tpu.memory_space<vmem>>, vector<128x128xbf16>,
    %c0_1 = arith.constant 0 : index
    %c0_2 = arith.constant 0 : index
    %2 = vector.load %arg1[%c0_1, %c0_2] : memref<128x5xf32, #tpu.memory_space<vmem>>, vector<128x5xf32>
    %3 = arith.truncf %2 : vector<128x5xf32> to vector<128x5xbf16>
    %c0_3 = arith.constant 0 : index
    %c0_4 = arith.constant 0 : index
    %4 = vector.load %arg9[%c0_3, %c0_4] : memref<128x128xbf16, #tpu.memory_space<vmem>>, vector<128x5xbf16>
    tpu.vector_store %arg9[%c0_3, %c0_4], %3 {strides = array<i32>} : memref<128x128xbf16, #tpu.memory_space<vmem>>, vector<128x5xbf16>,
    %c0_5 = arith.constant 0 : index
    %c0_6 = arith.constant 0 : index
    %5 = vector.load %arg9[%c0_5, %c0_6] : memref<128x128xbf16, #tpu.memory_space<vmem>>, vector<128x128xbf16>
    %c0_7 = arith.constant 0 : index
    %c0_8 = arith.constant 0 : index
    %6 = vector.load %arg2[%c0_7, %c0_8] : memref<128x128xbf16, #tpu.memory_space<vmem>>, vector<128x128xbf16>
    %cst_9 = arith.constant dense<0.000000e+00> : vector<128x128xf32>
    %7 = tpu.matmul %5, %6, %cst_9 {dimension_numbers = #tpu.dot_dimension_numbers<[1], [0], [0], [1], [0, 0, 1, 1], [], []>} : vector<128x128xbf16>, vector<128x128xbf16>, vector<128x128xf32> -> vector<128x128xf32>
    %c0_10 = arith.constant 0 : index
    %c0_11 = arith.constant 0 : index
    %8 = vector.load %arg3[%c0_10, %c0_11] : memref<1x128xf32, #tpu.memory_space<vmem>>, vector<1x128xf32>
    %9 = vector.broadcast %8 : vector<1x128xf32> to vector<128x128xf32>
    %10 = arith.addf %7, %9 : vector<128x128xf32>
    %cst_12 = arith.constant 0.000000e+00 : f32
    %11 = vector.broadcast %cst_12 : f32 to vector<128x128xf32>
    %12 = arith.maximumf %10, %11 : vector<128x128xf32>
    %13 = arith.truncf %12 : vector<128x128xf32> to vector<128x128xbf16>
    %c0_13 = arith.constant 0 : index
    %c0_14 = arith.constant 0 : index
    %14 = vector.load %arg4[%c0_13, %c0_14] : memref<128x128xbf16, #tpu.memory_space<vmem>>, vector<128x128xbf16>
    %cst_15 = arith.constant dense<0.000000e+00> : vector<128x128xf32>
    %15 = tpu.matmul %13, %14, %cst_15 {dimension_numbers = #tpu.dot_dimension_numbers<[1], [0], [0], [1], [0, 0, 1, 1], [], []>} : vector<128x128xbf16>, vector<128x128xbf16>, vector<128x128xf32> -> vector<128x128xf32>
    %c0_16 = arith.constant 0 : index
    %c0_17 = arith.constant 0 : index
    %16 = vector.load %arg5[%c0_16, %c0_17] : memref<1x128xf32, #tpu.memory_space<vmem>>, vector<1x128xf32>
    %17 = vector.broadcast %16 : vector<1x128xf32> to vector<128x128xf32>
    %18 = arith.addf %15, %17 : vector<128x128xf32>
    %cst_18 = arith.constant 0.000000e+00 : f32
    %19 = vector.broadcast %cst_18 : f32 to vector<128x128xf32>
    %20 = arith.maximumf %18, %19 : vector<128x128xf32>
    %21 = arith.truncf %20 : vector<128x128xf32> to vector<128x128xbf16>
    %c0_19 = arith.constant 0 : index
    %c0_20 = arith.constant 0 : index
    %22 = vector.load %arg6[%c0_19, %c0_20] : memref<128x128xbf16, #tpu.memory_space<vmem>>, vector<128x128xbf16>
    %cst_21 = arith.constant dense<0.000000e+00> : vector<128x128xf32>
    %23 = tpu.matmul %21, %22, %cst_21 {dimension_numbers = #tpu.dot_dimension_numbers<[1], [0], [0], [1], [0, 0, 1, 1], [], []>} : vector<128x128xbf16>, vector<128x128xbf16>, vector<128x128xf32> -> vector<128x128xf32>
    %c0_22 = arith.constant 0 : index
    %c0_23 = arith.constant 0 : index
    %24 = vector.load %arg7[%c0_22, %c0_23] : memref<1x128xf32, #tpu.memory_space<vmem>>, vector<1x128xf32>
    %25 = vector.broadcast %24 : vector<1x128xf32> to vector<128x128xf32>
    %26 = arith.addf %23, %25 : vector<128x128xf32>
    %27 = arith.truncf %26 : vector<128x128xf32> to vector<128x128xbf16>
    %c0_24 = arith.constant 0 : index
    %c0_25 = arith.constant 0 : index
    %28 = vector.load %arg8[%c0_24, %c0_25] : memref<128x128xbf16, #tpu.memory_space<vmem>>, vector<128x128xbf16>
    tpu.vector_store %arg8[%c0_24, %c0_25], %27 {strides = array<i32>} : memref<128x128xbf16, #tpu.memory_space<vmem>>, vector<128x128xbf16>,
    return
  }
  func.func @transform_0(%arg0: i32) -> (i32, i32) {
    %c0_i32 = arith.constant 0 : i32
    %c0_i32_0 = arith.constant 0 : i32
    return %arg0, %c0_i32 : i32, i32
  }
  func.func @transform_1(%arg0: i32) -> (i32, i32) {
    %c0_i32 = arith.constant 0 : i32
    %c0_i32_0 = arith.constant 0 : i32
    %c0_i32_1 = arith.constant 0 : i32
    return %c0_i32, %c0_i32_0 : i32, i32
  }
  func.func @transform_2(%arg0: i32) -> (i32, i32) {
    %c0_i32 = arith.constant 0 : i32
    %c0_i32_0 = arith.constant 0 : i32
    %c0_i32_1 = arith.constant 0 : i32
    return %c0_i32, %c0_i32_0 : i32, i32
  }
  func.func @transform_3(%arg0: i32) -> (i32, i32) {
    %c0_i32 = arith.constant 0 : i32
    %c0_i32_0 = arith.constant 0 : i32
    %c0_i32_1 = arith.constant 0 : i32
    return %c0_i32, %c0_i32_0 : i32, i32
  }
  func.func @transform_4(%arg0: i32) -> (i32, i32) {
    %c0_i32 = arith.constant 0 : i32
    %c0_i32_0 = arith.constant 0 : i32
    %c0_i32_1 = arith.constant 0 : i32
    return %c0_i32, %c0_i32_0 : i32, i32
  }
  func.func @transform_5(%arg0: i32) -> (i32, i32) {
    %c0_i32 = arith.constant 0 : i32
    %c0_i32_0 = arith.constant 0 : i32
    %c0_i32_1 = arith.constant 0 : i32
    return %c0_i32, %c0_i32_0 : i32, i32
  }
  func.func @transform_6(%arg0: i32) -> (i32, i32) {
    %c0_i32 = arith.constant 0 : i32
    %c0_i32_0 = arith.constant 0 : i32
    %c0_i32_1 = arith.constant 0 : i32
    return %c0_i32, %c0_i32_0 : i32, i32
  }
  func.func @transform_7(%arg0: i32) -> (i32, i32) {
    %c0_i32 = arith.constant 0 : i32
    %c0_i32_0 = arith.constant 0 : i32
    return %arg0, %c0_i32 : i32, i32
  }
}

module attributes {stable_mosaic.version = 11 : i64} {
  func.func @_dqn_kernel(%arg0: i32, %arg1: memref<128x5xf32, #tpu.memory_space<vmem>>, %arg2: memref<128x128xbf16, #tpu.memory_space<vmem>>, %arg3: memref<1x128xf32, #tpu.memory_space<vmem>>, %arg4: memref<128x128xbf16, #tpu.memory_space<vmem>>, %arg5: memref<1x128xf32, #tpu.memory_space<vmem>>, %arg6: memref<128x128xbf16, #tpu.memory_space<vmem>>, %arg7: memref<1x128xf32, #tpu.memory_space<vmem>>, %arg8: memref<128x128xbf16, #tpu.memory_space<vmem>>, %arg9: memref<128x128xbf16, #tpu.memory_space<vmem>>) attributes {dimension_semantics = [#tpu.dimension_semantics<parallel>], iteration_bounds = array<i64: 2>, scalar_prefetch = 0 : i64, scratch_operands = 1 : i64, tpu.core_type = #tpu.core_type<tc>, window_params = [{transform_indices = @transform_0, window_bounds = array<i64: 128, 5>}, {pipeline_mode = #tpu.pipeline_mode<synchronous>, transform_indices = @transform_1, window_bounds = array<i64: 128, 128>}, {pipeline_mode = #tpu.pipeline_mode<synchronous>, transform_indices = @transform_2, window_bounds = array<i64: 1, 128>}, {pipeline_mode = #tpu.pipeline_mode<synchronous>, transform_indices = @transform_3, window_bounds = array<i64: 128, 128>}, {pipeline_mode = #tpu.pipeline_mode<synchronous>, transform_indices = @transform_4, window_bounds = array<i64: 1, 128>}, {pipeline_mode = #tpu.pipeline_mode<synchronous>, transform_indices = @transform_5, window_bounds = array<i64: 128, 128>}, {pipeline_mode = #tpu.pipeline_mode<synchronous>, transform_indices = @transform_6, window_bounds = array<i64: 1, 128>}, {transform_indices = @transform_7, window_bounds = array<i64: 128, 128>}]} {
    %cst = arith.constant 0.000000e+00 : bf16
    %0 = vector.broadcast %cst : bf16 to vector<128x128xbf16>
    %c0 = arith.constant 0 : index
    %c0_0 = arith.constant 0 : index
    %1 = vector.load %arg9[%c0, %c0_0] : memref<128x128xbf16, #tpu.memory_space<vmem>>, vector<128x128xbf16>
    tpu.vector_store %arg9[%c0, %c0_0], %0 {strides = array<i32>} : memref<128x128xbf16, #tpu.memory_space<vmem>>, vector<128x128xbf16>,
    %c0_1 = arith.constant 0 : index
    %c0_2 = arith.constant 0 : index
    %2 = vector.load %arg1[%c0_1, %c0_2] : memref<128x5xf32, #tpu.memory_space<vmem>>, vector<128x5xf32>
    %3 = arith.truncf %2 : vector<128x5xf32> to vector<128x5xbf16>
    %c0_3 = arith.constant 0 : index
    %c0_4 = arith.constant 0 : index
    %4 = vector.load %arg9[%c0_3, %c0_4] : memref<128x128xbf16, #tpu.memory_space<vmem>>, vector<128x5xbf16>
    tpu.vector_store %arg9[%c0_3, %c0_4], %3 {strides = array<i32>} : memref<128x128xbf16, #tpu.memory_space<vmem>>, vector<128x5xbf16>,
    %c0_5 = arith.constant 0 : index
    %c0_6 = arith.constant 0 : index
    %5 = vector.load %arg9[%c0_5, %c0_6] : memref<128x128xbf16, #tpu.memory_space<vmem>>, vector<128x128xbf16>
    %c0_7 = arith.constant 0 : index
    %c0_8 = arith.constant 0 : index
    %6 = vector.load %arg2[%c0_7, %c0_8] : memref<128x128xbf16, #tpu.memory_space<vmem>>, vector<128x128xbf16>
    %cst_9 = arith.constant dense<0.000000e+00> : vector<128x128xf32>
    %7 = tpu.matmul %5, %6, %cst_9 {dimension_numbers = #tpu.dot_dimension_numbers<[1], [0], [0], [1], [0, 0, 1, 1], [], []>} : vector<128x128xbf16>, vector<128x128xbf16>, vector<128x128xf32> -> vector<128x128xf32>
    %c0_10 = arith.constant 0 : index
    %c0_11 = arith.constant 0 : index
    %8 = vector.load %arg3[%c0_10, %c0_11] : memref<1x128xf32, #tpu.memory_space<vmem>>, vector<1x128xf32>
    %9 = vector.broadcast %8 : vector<1x128xf32> to vector<128x128xf32>
    %10 = arith.addf %7, %9 : vector<128x128xf32>
    %cst_12 = arith.constant 0.000000e+00 : f32
    %11 = vector.broadcast %cst_12 : f32 to vector<128x128xf32>
    %12 = arith.maximumf %10, %11 : vector<128x128xf32>
    %13 = arith.truncf %12 : vector<128x128xf32> to vector<128x128xbf16>
    %c0_13 = arith.constant 0 : index
    %c0_14 = arith.constant 0 : index
    %14 = vector.load %arg4[%c0_13, %c0_14] : memref<128x128xbf16, #tpu.memory_space<vmem>>, vector<128x128xbf16>
    %cst_15 = arith.constant dense<0.000000e+00> : vector<128x128xf32>
    %15 = tpu.matmul %13, %14, %cst_15 {dimension_numbers = #tpu.dot_dimension_numbers<[1], [0], [0], [1], [0, 0, 1, 1], [], []>} : vector<128x128xbf16>, vector<128x128xbf16>, vector<128x128xf32> -> vector<128x128xf32>
    %c0_16 = arith.constant 0 : index
    %c0_17 = arith.constant 0 : index
    %16 = vector.load %arg5[%c0_16, %c0_17] : memref<1x128xf32, #tpu.memory_space<vmem>>, vector<1x128xf32>
    %17 = vector.broadcast %16 : vector<1x128xf32> to vector<128x128xf32>
    %18 = arith.addf %15, %17 : vector<128x128xf32>
    %cst_18 = arith.constant 0.000000e+00 : f32
    %19 = vector.broadcast %cst_18 : f32 to vector<128x128xf32>
    %20 = arith.maximumf %18, %19 : vector<128x128xf32>
    %21 = arith.truncf %20 : vector<128x128xf32> to vector<128x128xbf16>
    %c0_19 = arith.constant 0 : index
    %c0_20 = arith.constant 0 : index
    %22 = vector.load %arg6[%c0_19, %c0_20] : memref<128x128xbf16, #tpu.memory_space<vmem>>, vector<128x128xbf16>
    %cst_21 = arith.constant dense<0.000000e+00> : vector<128x128xf32>
    %23 = tpu.matmul %21, %22, %cst_21 {dimension_numbers = #tpu.dot_dimension_numbers<[1], [0], [0], [1], [0, 0, 1, 1], [], []>} : vector<128x128xbf16>, vector<128x128xbf16>, vector<128x128xf32> -> vector<128x128xf32>
    %c0_22 = arith.constant 0 : index
    %c0_23 = arith.constant 0 : index
    %24 = vector.load %arg7[%c0_22, %c0_23] : memref<1x128xf32, #tpu.memory_space<vmem>>, vector<1x128xf32>
    %25 = vector.broadcast %24 : vector<1x128xf32> to vector<128x128xf32>
    %26 = arith.addf %23, %25 : vector<128x128xf32>
    %27 = arith.truncf %26 : vector<128x128xf32> to vector<128x128xbf16>
    %c0_24 = arith.constant 0 : index
    %c0_25 = arith.constant 0 : index
    %28 = vector.load %arg8[%c0_24, %c0_25] : memref<128x128xbf16, #tpu.memory_space<vmem>>, vector<128x128xbf16>
    tpu.vector_store %arg8[%c0_24, %c0_25], %27 {strides = array<i32>} : memref<128x128xbf16, #tpu.memory_space<vmem>>, vector<128x128xbf16>,
    return
  }
  func.func @transform_0(%arg0: i32) -> (i32, i32) {
    %c0_i32 = arith.constant 0 : i32
    %c0_i32_0 = arith.constant 0 : i32
    return %arg0, %c0_i32 : i32, i32
  }
  func.func @transform_1(%arg0: i32) -> (i32, i32) {
    %c0_i32 = arith.constant 0 : i32
    %c0_i32_0 = arith.constant 0 : i32
    %c0_i32_1 = arith.constant 0 : i32
    return %c0_i32, %c0_i32_0 : i32, i32
  }
  func.func @transform_2(%arg0: i32) -> (i32, i32) {
    %c0_i32 = arith.constant 0 : i32
    %c0_i32_0 = arith.constant 0 : i32
    %c0_i32_1 = arith.constant 0 : i32
    return %c0_i32, %c0_i32_0 : i32, i32
  }
  func.func @transform_3(%arg0: i32) -> (i32, i32) {
    %c0_i32 = arith.constant 0 : i32
    %c0_i32_0 = arith.constant 0 : i32
    %c0_i32_1 = arith.constant 0 : i32
    return %c0_i32, %c0_i32_0 : i32, i32
  }
  func.func @transform_4(%arg0: i32) -> (i32, i32) {
    %c0_i32 = arith.constant 0 : i32
    %c0_i32_0 = arith.constant 0 : i32
    %c0_i32_1 = arith.constant 0 : i32
    return %c0_i32, %c0_i32_0 : i32, i32
  }
  func.func @transform_5(%arg0: i32) -> (i32, i32) {
    %c0_i32 = arith.constant 0 : i32
    %c0_i32_0 = arith.constant 0 : i32
    %c0_i32_1 = arith.constant 0 : i32
    return %c0_i32, %c0_i32_0 : i32, i32
  }
  func.func @transform_6(%arg0: i32) -> (i32, i32) {
    %c0_i32 = arith.constant 0 : i32
    %c0_i32_0 = arith.constant 0 : i32
    %c0_i32_1 = arith.constant 0 : i32
    return %c0_i32, %c0_i32_0 : i32, i32
  }
  func.func @transform_7(%arg0: i32) -> (i32, i32) {
    %c0_i32 = arith.constant 0 : i32
    %c0_i32_0 = arith.constant 0 : i32
    return %arg0, %c0_i32 : i32, i32
  }
}

</mosaic_0001>

<bundles_post_ra>
// kernel: tpu_custom_call.1
= control target key start
LH: loop header
LB: loop body
LE: loop exit
PB: predicated region body
PF: predicated region fallthrough
CT: control target
= control target key end

     0   :  { %12 = vsyncpa [#allocation4], 0  ;;  %s1751_s0 = inlined_call_operand.vmem [shape: f32[256,5], index: 0, kind: input, shape index: {}]   ;;  %s1752_s1 = inlined_call_operand.vmem [shape: bf16[128,128], index: 1, kind: input, shape index: {}]   ;;  %s1753_s2 = inlined_call_operand.vmem [shape: f32[1,128], index: 2, kind: input, shape index: {}]   ;;  %s1754_s3 = inlined_call_operand.vmem [shape: bf16[128,128], index: 3, kind: input, shape index: {}]   ;;  %s1755_s4 = inlined_call_operand.vmem [shape: f32[1,128], index: 4, kind: input, shape index: {}]   ;;  %s1756_s5 = inlined_call_operand.vmem [shape: bf16[128,128], index: 5, kind: input, shape index: {}]   ;;  %s1757_s6 = inlined_call_operand.vmem [shape: f32[1,128], index: 6, kind: input, shape index: {}]   ;;  %s1758_s7 = inlined_call_operand.hbm [shape: bf16[256,128], index: 7, kind: output, shape index: {}]  }
   0x1   :  { %14 = vsyncpa [#allocation4 + $0x1], 0  ;;  %s1491_s24 = smov 0   ;;  %s1493_s25 = smov 0  }
   0x2   :  { %s1495_s26 = smov 0   ;;  %s1497_s27 = smov 0  }
   0x3 LB: > { %s1512_s28 = sadd.s32 4294967295, %s1445_s27   ;;  %s1038_s29 = sadd.s32 4294967294, %s1445_s27   ;;  %s1445_s27 = sphi %s1497_s27, %s1764_s27   ;;  %s1441_s26 = sphi %s1495_s26, %s1763_s26   ;;  %s1437_s25 = sphi %s1493_s25, %s1762_s25   ;;  %s1433_s24 = sphi %s1491_s24, %s1761_s24  }
   0x4   : > { %s1516_s30 = sadd.s32 1, %s1445_s27   ;;  %s179_s8 = sadd.s32 1, %s1441_s26 }
   0x5   : > { %s176_s9 = ssub.s32 %s1445_s27, %s1516_s30  ;;  %p189_p0 = scmp.ne.s32.totalorder %s1441_s26, %s1437_s25 }
   0x6   : > { %p177_p1 = scmp.eq.s32.totalorder %s176_s9, 0  ;;  %p190_p2 = scmp.eq.s32.totalorder %s1512_s28, 1 }
   0x7   : > { %p195_p3 = scmp.ne.s32.totalorder %s1437_s25, %s1433_s24  ;;  %p196_p4 = scmp.eq.s32.totalorder %s1038_s29, 1 }
   0x8   : > { %s1527_s10 = scalar_select %p177_p1, %s1441_s26, %s179_s8  }
   0x9   : > { %p1529_p5 = por %p190_p2, %p189_p0  ;;  %p1533_p6 = por %p196_p4, %p195_p3 }
   0xa   : > { %p1041_p7 = scmp.ge.s32.totalorder %s1445_s27, 1  ;;  %p241_p8 = scmp.lt.s32.totalorder %s1445_s27, 3 }
   0xc   : > { %p242_p9 = pnand %p1041_p7, %p241_p8 }
   0xd   : > { %v1359_v0 = vld [vmem:[%s1752_s1] sm:$0xff] (!%p242_p9)   ;;  %s1043_s15 = sshll.u32 (!%p242_p9), %s1512_s28, 4  ;;  %v1360_v1 = vld [vmem:[%s1752_s1 + $0x8] sm:$0xff] (!%p242_p9)   ;;  %v1447_v2 = vmov (!%p242_p9), 0   ;;  %v1361_v3 = vld [vmem:[%s1752_s1 + $0x10] sm:$0xff] (!%p242_p9)   ;;  %vm313_vm0 = vcmask (!%p242_p9), 39936  }
   0xe   : > { %245 = sbr.rel (%p242_p9) target bundleno = 748 (0x2ec), region = 48  ;;  %p274_p10 = scmp.lt.s32.totalorder (!%p242_p9), %s1043_s15, 31  ;;  %1205 = vmatprep.subr.bf16.mxu0 (!%p242_p9), %v1359_v0  ;;  %281 = vst [vmem:[#allocation2] sm:$0xff] (!%p242_p9), %v1447_v2  ;;  %282 = vst [vmem:[#allocation2 + $0x8] sm:$0xff] (!%p242_p9), %v1447_v2  ;;  %v1362_v4 = vld [vmem:[%s1752_s1 + $0x18] sm:$0xff] (!%p242_p9)   ;;  %v1363_v12 = vld [vmem:[%s1752_s1 + $0x20] sm:$0xff] (!%p242_p9)  }
   0xf   : > { %1206 = vmatpush3.bf16.msra.mxu0 (!%p242_p9), %v1359_v0  ;;  %283 = vst [vmem:[#allocation2 + $0x10] sm:$0xff] (!%p242_p9), %v1447_v2  ;;  %284 = vst [vmem:[#allocation2 + $0x18] sm:$0xff] (!%p242_p9), %v1447_v2  ;;  %v1367_v30 = vld [vmem:[%s1754_s3] sm:$0xff] (!%p242_p9)   ;;  %v1368_v31 = vld [vmem:[%s1754_s3 + $0x8] sm:$0xff] (!%p242_p9)   ;;  %s270_s14 = sand.u32 (!%p242_p9), 1, %s1437_s25   ;;  %s1109_s19 = sshll.u32 (!%p242_p9), %s1512_s28, 10 }
  0x10   : > { %285 = vst [vmem:[#allocation2 + $0x20] sm:$0xff] (!%p242_p9), %v1447_v2  ;;  %286 = vst [vmem:[#allocation2 + $0x28] sm:$0xff] (!%p242_p9), %v1447_v2  ;;  %1207 = vmatprep.subr.bf16.mxu0 (!%p242_p9), %v1360_v1  ;;  %v1364_v32 = vld [vmem:[%s1752_s1 + $0x28] sm:$0xff] (!%p242_p9)   ;;  %1237 = vmatprep.subr.bf16.mxu1 (!%p242_p9), %v1367_v30  ;;  %v1369_v34 = vld [vmem:[%s1754_s3 + $0x10] sm:$0xff] (!%p242_p9)   ;;  %s1042_s17 = sshll.u32 (!%p242_p9), %s270_s14, 6  ;;  %s1710_s28 = scalar_lea.sflag (!%p242_p9), [#allocation4], %s270_s14 }
  0x11   : > { %287 = vst [vmem:[#allocation2 + $0x30] sm:$0xff] (!%p242_p9), %v1447_v2  ;;  %288 = vst [vmem:[#allocation2 + $0x38] sm:$0xff] (!%p242_p9), %v1447_v2  ;;  %1238 = vmatpush3.bf16.msra.mxu1 (!%p242_p9), %v1367_v30  ;;  %v1365_v35 = vld [vmem:[%s1752_s1 + $0x30] sm:$0xff] (!%p242_p9)   ;;  %v1370_v36 = vld [vmem:[%s1754_s3 + $0x18] sm:$0xff] (!%p242_p9)   ;;  %s1689_s18 = scalar_lea.vmem (!%p242_p9), [#allocation3], %s1042_s17  ;;  %s1448_s8 = smov (!%p242_p9), [#allocation3]  }
  0x12   : > { %1239 = vmatprep.subr.bf16.mxu1 (!%p242_p9), %v1368_v31  ;;  %v1366_v37 = vld [vmem:[%s1752_s1 + $0x38] sm:$0xff] (!%p242_p9)   ;;  %v1371_v38 = vld [vmem:[%s1754_s3 + $0x20] sm:$0xff] (!%p242_p9)   ;;  %v1372_v39 = vld [vmem:[%s1754_s3 + $0x28] sm:$0xff] (!%p242_p9)   ;;  %s1387_s9 = sshll.u32 (!%p242_p9), %s1448_s8, 4  ;;  %s1388_s9 = int_to_ptr.vmem [resolvable:$false] %s1387_s9 }
  0x13   : > { %1208 = vmatpush3.bf16.msra.mxu0 (!%p242_p9), %v1360_v1  ;;  %v1373_v47 = vld [vmem:[%s1754_s3 + $0x30] sm:$0xff] (!%p242_p9)   ;;  %v1374_v48 = vld [vmem:[%s1754_s3 + $0x38] sm:$0xff] (!%p242_p9)   ;;  %v1375_v49 = vld [vmem:[%s1756_s5] sm:$0xff] (!%p242_p9)   ;;  %s1389_s13 = scalar_lea.vmem (!%p242_p9), %s1388_s9, 2048 }
  0x14   : > { %1209 = vmatprep.subr.bf16.mxu0 (!%p242_p9), %v1361_v3  ;;  %v1376_v50 = vld [vmem:[%s1756_s5 + $0x8] sm:$0xff] (!%p242_p9)   ;;  %v1377_v51 = vld [vmem:[%s1756_s5 + $0x10] sm:$0xff] (!%p242_p9)   ;;  %v1629_v52 = vld [vmem:[%s1756_s5 + $0x18] sm:$0xff] (!%p242_p9)  }
  0x15   : > { %s1766_s15 = smov (!%p274_p10, %s1043_s15), 31  ;;  %1240 = vmatpush3.bf16.msra.mxu1 %v1368_v31  ;;  %v1635_v53 = vld [vmem:[%s1756_s5 + $0x20] sm:$0xff]   ;;  %v1642_v54 = vld [vmem:[%s1756_s5 + $0x28] sm:$0xff]  }
  0x16   : > { %s1044_s20 = sshll.u32 %s1766_s15, 3  ;;  %1241 = vmatprep.subr.bf16.mxu1 %v1369_v34  ;;  %v1650_v55 = vld [vmem:[%s1753_s2] ss:$0 sm:$0xff] }
  0x17   : > { %s1552_s23 = scalar_lea.vmem %s1751_s0, %s1044_s20  ;;  %1210 = vmatpush3.bf16.msra.mxu0 %v1361_v3  ;;  %s976_s20 = sshll.u32 %s1689_s18, 4  ;;  %s1704_s20 = int_to_ptr.vmem [resolvable:$true] %s976_s20 }
  0x18   : > { %v289_v5 = vld [vmem:[%s1552_s23] sm:$0xff]  ;;  %v290_v6 = vld [vmem:[%s1552_s23 + $0x8] sm:$0xff]  ;;  %v291_v7 = vld [vmem:[%s1552_s23 + $0x10] sm:$0xff]  ;;  %1211 = vmatprep.subr.bf16.mxu0 %v1362_v4  ;;  %s1383_s29 = scalar_lea.vmem %s1704_s20, 1024  ;;  %p1390_p0 = scmp.lt.s32.totalorder %s1704_s20, %s1388_s9 }
  0x19   : > { %v305_v8 = vpack.c.bf16 %v290_v6, %v289_v5  ;;  %v292_v9 = vld [vmem:[%s1552_s23 + $0x18] sm:$0xff]  ;;  %v293_v10 = vld [vmem:[%s1552_s23 + $0x20] sm:$0xff]  ;;  %v294_v11 = vld [vmem:[%s1552_s23 + $0x28] sm:$0xff]  ;;  %1242 = vmatpush3.bf16.msra.mxu1 %v1369_v34  ;;  %p1384_p11 = scmp.ne.s32.totalorder %s1704_s20, %s1383_s29  ;;  %p1391_p1 = scmp.lt.s32.totalorder %s1389_s13, %s1383_s29 }
  0x1a   : > { %v306_v13 = vpack.c.bf16 %v292_v9, %v291_v7  ;;  %v307_v14 = vpack.c.bf16 %v294_v11, %v293_v10  ;;  %v295_v15 = vld [vmem:[%s1552_s23 + $0x30] sm:$0xff]  ;;  %v296_v16 = vld [vmem:[%s1552_s23 + $0x38] sm:$0xff]  ;;  %v297_v17 = vld [vmem:[%s1552_s23 + $0x40] sm:$0xff]  ;;  %1243 = vmatprep.subr.bf16.mxu1 %v1370_v36 }
  0x1b   : > { %314 = vst.msk [vmem:[#allocation2] sm:$0xff] %vm313_vm0, %v305_v8  ;;  %v308_v18 = vpack.c.bf16 %v296_v16, %v295_v15  ;;  %v298_v19 = vld [vmem:[%s1552_s23 + $0x48] sm:$0xff]  ;;  %v299_v20 = vld [vmem:[%s1552_s23 + $0x50] sm:$0xff]  ;;  %v300_v21 = vld [vmem:[%s1552_s23 + $0x58] sm:$0xff]  ;;  %1212 = vmatpush3.bf16.msra.mxu0 %v1362_v4  ;;  %p1385_p12 = pnand %p1384_p11, %p1529_p5  ;;  %p1392_p2 = por %p1391_p1, %p1390_p0 }
  0x1c   : > { %315 = vst.msk [vmem:[#allocation2 + $0x8] sm:$0xff] %vm313_vm0, %v306_v13  ;;  %316 = vst.msk [vmem:[#allocation2 + $0x10] sm:$0xff] %vm313_vm0, %v307_v14  ;;  %v309_v22 = vpack.c.bf16 %v298_v19, %v297_v17  ;;  %v310_v23 = vpack.c.bf16 %v300_v21, %v299_v20  ;;  %v301_v24 = vld [vmem:[%s1552_s23 + $0x60] sm:$0xff]  ;;  %v302_v25 = vld [vmem:[%s1552_s23 + $0x68] sm:$0xff]  ;;  %1213 = vmatprep.subr.bf16.mxu0 %v1363_v12 }
  0x1d   : > { %v303_v26 = vld [vmem:[%s1552_s23 + $0x70] sm:$0xff]  ;;  %317 = vst.msk [vmem:[#allocation2 + $0x18] sm:$0xff] %vm313_vm0, %v308_v18  ;;  %v311_v27 = vpack.c.bf16 %v302_v25, %v301_v24  ;;  %v304_v28 = vld [vmem:[%s1552_s23 + $0x78] sm:$0xff]  ;;  %1244 = vmatpush3.bf16.msra.mxu1 %v1370_v36  ;;  %s1702_s23 = scalar_lea.hbm %s1758_s7, %s1109_s19  ;;  %p1386_p13 = pneg %p1385_p12 }
  0x1e   : > { %318 = vst.msk [vmem:[#allocation2 + $0x20] sm:$0xff] %vm313_vm0, %v309_v22  ;;  %319 = vst.msk [vmem:[#allocation2 + $0x28] sm:$0xff] %vm313_vm0, %v310_v23  ;;  %v312_v29 = vpack.c.bf16 %v304_v28, %v303_v26  ;;  %1245 = vmatprep.subr.bf16.mxu1 %v1371_v38 }
  0x1f   : > { %320 = vst.msk [vmem:[#allocation2 + $0x30] sm:$0xff] %vm313_vm0, %v311_v27  ;;  %1214 = vmatpush3.bf16.msra.mxu0 %v1363_v12  ;;  %p1393_p3 = pnand %p1392_p2, %p1386_p13 }
  0x20   : > { %321 = vst.msk [vmem:[#allocation2 + $0x38] sm:$0xff] %vm313_vm0, %v312_v29  ;;  %1215 = vmatprep.subr.bf16.mxu0 %v1364_v32 }
  0x21   : > { %1246 = vmatpush3.bf16.msra.mxu1 %v1371_v38 }
  0x22   : > { %v322_v33 = vld [vmem:[#allocation2] sm:$0xff]  ;;  %1247 = vmatprep.subr.bf16.mxu1 %v1372_v39 }
  0x23   : > { %1221 = vmatprep.mubr.bf16.mxu0 %v322_v33  ;;  %1216 = vmatpush3.bf16.msra.mxu0 %v1364_v32  ;;  %v323_v40 = vld [vmem:[#allocation2 + $0x8] sm:$0xff]  ;;  %v324_v41 = vld [vmem:[#allocation2 + $0x10] sm:$0xff] }
  0x24   : > { %1217 = vmatprep.subr.bf16.mxu0 %v1365_v35  ;;  %v325_v42 = vld [vmem:[#allocation2 + $0x18] sm:$0xff] }
  0x25   : > { %1248 = vmatpush3.bf16.msra.mxu1 %v1372_v39  ;;  %v326_v43 = vld [vmem:[#allocation2 + $0x20] sm:$0xff]  ;;  %v327_v44 = vld [vmem:[#allocation2 + $0x28] sm:$0xff] }
  0x26   : > { %v328_v45 = vld [vmem:[#allocation2 + $0x30] sm:$0xff]  ;;  %1249 = vmatprep.subr.bf16.mxu1 %v1373_v47 }
  0x27   : > { %1218 = vmatpush3.bf16.msra.mxu0 %v1365_v35  ;;  %v329_v46 = vld [vmem:[#allocation2 + $0x38] sm:$0xff] }
  0x28   : > { %1219 = vmatprep.subr.bf16.mxu0 %v1366_v37 }
  0x29   : > { %1250 = vmatpush3.bf16.msra.mxu1 %v1373_v47 }
  0x2a   : > { %1251 = vmatprep.subr.bf16.mxu1 %v1374_v48 }
  0x2b   : > { %1220 = vmatpush3.bf16.msra.mxu0 %v1366_v37 }
  0x2c   : > { %1269 = vmatprep.subr.bf16.mxu0 %v1375_v49 }
  0x2d   : > { %1252 = vmatpush3.bf16.msra.mxu1 %v1374_v48  ;;  %v1381_v48 = vld [vmem:[%s1756_s5 + $0x30] sm:$0xff]  }
  0x2e   : > { %1222 = vmatmul.mubr.bf16.vlgmr.msra.gmra.mrb[0].mxu0 %v323_v40  ;;  %1301 = vmatprep.subr.bf16.mxu1 %v1375_v49 }
  0x2f   : > { %1225 = vmatprep.mubr.bf16.mxu0 %v324_v41  ;;  %1270 = vmatpush3.bf16.msra.mxu0 %v1375_v49 }
  0x30   : > { %1271 = vmatprep.subr.bf16.mxu0 %v1376_v50 }
  0x33   : > { %1272 = vmatpush3.bf16.msra.mxu0 %v1376_v50 }
  0x34   : > { %1273 = vmatprep.subr.bf16.mxu0 %v1377_v51 }
  0x36   : > { %1226 = vmatmul.mubr.bf16.gmra.mrb[4].mxu0 %v325_v42 }
  0x37   : > { %1229 = vmatprep.mubr.bf16.mxu0 %v326_v43  ;;  %1274 = vmatpush3.bf16.msra.mxu0 %v1377_v51 }
  0x38   : > { %1275 = vmatprep.subr.bf16.mxu0 %v1629_v52 }
  0x3b   : > { %1276 = vmatpush3.bf16.msra.mxu0 %v1629_v52 }
  0x3c   : > { %1277 = vmatprep.subr.bf16.mxu0 %v1635_v53 }
  0x3e   : > { %1230 = vmatmul.mubr.bf16.gmra.mrb[8].mxu0 %v327_v44 }
  0x3f   : > { %1233 = vmatprep.mubr.bf16.mxu0 %v328_v45  ;;  %1278 = vmatpush3.bf16.msra.mxu0 %v1635_v53 }
  0x40   : > { %1279 = vmatprep.subr.bf16.mxu0 %v1642_v54 }
  0x43   : > { %1280 = vmatpush3.bf16.msra.mxu0 %v1642_v54 }
  0x44   : > { %1281 = vmatprep.subr.bf16.mxu0 %v1381_v48 }
  0x46   : > { %1234 = vmatmul.mubr.bf16.gmra.mrb[12].mxu0 %v329_v46 }
  0x47   : > { %1282 = vmatpush3.bf16.msra.mxu0 %v1381_v48 }
 0x101   : > { %v1223_v56 = vpop.f32.mrb[0].mxu0 }
 0x102   : > { %v444_v57 = vadd.f32 %v1223_v56, %v1650_v55  ;;  %v435_v58 = vpop.f32.mrb[1].mxu0 }
 0x103   : > { %v436_v59 = vadd.f32 %v1650_v55, %v435_v58  ;;  %v1224_v60 = vpop.f32.mrb[2].mxu0 }
 0x104   : > { %v447_v61 = vadd.f32 %v1224_v60, %v1650_v55  ;;  %v438_v62 = vpop.f32.mrb[3].mxu0  ;;  %v500_v0 = vmax.f32 %v444_v57, 0.0 }
 0x105   : > { %v439_v63 = vadd.f32 %v1650_v55, %v438_v62  ;;  %v498_v2 = vmax.f32 %v436_v59, 0.0 }
 0x106   : > { %v501_v1 = vmax.f32 %v447_v61, 0.0 }
 0x107   : > { %v499_v3 = vmax.f32 %v439_v63, 0.0 }
 0x108   : > { %v515_v4 = vpack.c.bf16 %v501_v1, %v500_v0 }
 0x109   : > { %v1227_v5 = vpop.f32.mrb[4].mxu0  ;;  %v514_v6 = vpack.c.bf16 %v499_v3, %v498_v2 }
 0x10a   : > { %v460_v7 = vadd.f32 %v1227_v5, %v1650_v55  ;;  %v451_v8 = vpop.f32.mrb[5].mxu0 }
 0x10b   : > { %v452_v9 = vadd.f32 %v1650_v55, %v451_v8  ;;  %v1228_v10 = vpop.f32.mrb[6].mxu0  ;;  %1253 = vmatprep.mubr.bf16.mxu1 %v514_v6 }
 0x10c   : > { %v463_v11 = vadd.f32 %v1228_v10, %v1650_v55  ;;  %v454_v12 = vpop.f32.mrb[7].mxu0  ;;  %1254 = vmatmul.mubr.bf16.vlgmr.msra.gmra.mrb[0].mxu1 %v515_v4  ;;  %v504_v14 = vmax.f32 %v460_v7, 0.0 }
 0x10d   : > { %v455_v13 = vadd.f32 %v1650_v55, %v454_v12  ;;  %1309 = vmatpush3.bf16.msra.mxu1 %v1375_v49  ;;  %v502_v16 = vmax.f32 %v452_v9, 0.0  ;;  %v1382_v49 = vld [vmem:[%s1756_s5 + $0x38] sm:$0xff]  }
 0x10e   : > { %v505_v15 = vmax.f32 %v463_v11, 0.0  ;;  %1302 = vmatprep.subr.bf16.mxu1 %v1376_v50  ;;  %1283 = vmatprep.subr.bf16.mxu0 %v1382_v49 }
 0x10f   : > { %v503_v17 = vmax.f32 %v455_v13, 0.0  ;;  %1284 = vmatpush3.bf16.msra.mxu0 %v1382_v49 }
 0x110   : > { %v517_v18 = vpack.c.bf16 %v505_v15, %v504_v14 }
 0x111   : > { %v516_v19 = vpack.c.bf16 %v503_v17, %v502_v16  ;;  %v1231_v20 = vpop.f32.mrb[8].mxu0  ;;  %1310 = vmatpush3.bf16.msra.mxu1 %v1376_v50  ;;  %v1054_v50 = vld [vmem:[%s1755_s4] ss:$0 sm:$0xff] }
 0x112   : > { %v476_v21 = vadd.f32 %v1231_v20, %v1650_v55  ;;  %v467_v22 = vpop.f32.mrb[9].mxu0  ;;  %1303 = vmatprep.subr.bf16.mxu1 %v1377_v51 }
 0x113   : > { %v468_v23 = vadd.f32 %v1650_v55, %v467_v22  ;;  %v1232_v24 = vpop.f32.mrb[10].mxu0  ;;  %1257 = vmatprep.mubr.bf16.mxu1 %v516_v19 }
 0x114   : > { %v479_v25 = vadd.f32 %v1232_v24, %v1650_v55  ;;  %v470_v26 = vpop.f32.mrb[11].mxu0  ;;  %1258 = vmatmul.mubr.bf16.gmra.mrb[4].mxu1 %v517_v18  ;;  %v508_v28 = vmax.f32 %v476_v21, 0.0 }
 0x115   : > { %v471_v27 = vadd.f32 %v1650_v55, %v470_v26  ;;  %1311 = vmatpush3.bf16.msra.mxu1 %v1377_v51  ;;  %v506_v30 = vmax.f32 %v468_v23, 0.0 }
 0x116   : > { %v509_v29 = vmax.f32 %v479_v25, 0.0  ;;  %1304 = vmatprep.subr.bf16.mxu1 %v1629_v52 }
 0x117   : > { %v507_v31 = vmax.f32 %v471_v27, 0.0 }
 0x118   : > { %v519_v32 = vpack.c.bf16 %v509_v29, %v508_v28 }
 0x119   : > { %v518_v33 = vpack.c.bf16 %v507_v31, %v506_v30  ;;  %v1235_v34 = vpop.f32.mrb[12].mxu0  ;;  %1312 = vmatpush3.bf16.msra.mxu1 %v1629_v52 }
 0x11a   : > { %v492_v35 = vadd.f32 %v1235_v34, %v1650_v55  ;;  %v483_v36 = vpop.f32.mrb[13].mxu0  ;;  %1305 = vmatprep.subr.bf16.mxu1 %v1635_v53 }
 0x11b   : > { %v484_v37 = vadd.f32 %v1650_v55, %v483_v36  ;;  %v1236_v38 = vpop.f32.mrb[14].mxu0  ;;  %1261 = vmatprep.mubr.bf16.mxu1 %v518_v33 }
 0x11c   : > { %v495_v39 = vadd.f32 %v1236_v38, %v1650_v55  ;;  %v486_v40 = vpop.f32.mrb[15].mxu0  ;;  %1262 = vmatmul.mubr.bf16.gmra.mrb[8].mxu1 %v519_v32  ;;  %v512_v42 = vmax.f32 %v492_v35, 0.0 }
 0x11d   : > { %v487_v41 = vadd.f32 %v1650_v55, %v486_v40  ;;  %1313 = vmatpush3.bf16.msra.mxu1 %v1635_v53  ;;  %v510_v44 = vmax.f32 %v484_v37, 0.0 }
 0x11e   : > { %v513_v43 = vmax.f32 %v495_v39, 0.0  ;;  %1306 = vmatprep.subr.bf16.mxu1 %v1642_v54 }
 0x11f   : > { %v511_v45 = vmax.f32 %v487_v41, 0.0 }
 0x120   : > { %v521_v46 = vpack.c.bf16 %v513_v43, %v512_v42 }
 0x121   : > { %v520_v47 = vpack.c.bf16 %v511_v45, %v510_v44  ;;  %1314 = vmatpush3.bf16.msra.mxu1 %v1642_v54  ;;  %v1063_v44 = vld [vmem:[%s1757_s6] ss:$0 sm:$0xff] }
 0x122   : > { %1307 = vmatprep.subr.bf16.mxu1 %v1381_v48 }
 0x123   : > { %1265 = vmatprep.mubr.bf16.mxu1 %v520_v47 }
 0x124   : > { %1266 = vmatmul.mubr.bf16.gmra.mrb[12].mxu1 %v521_v46 }
 0x125   : > { %1315 = vmatpush3.bf16.msra.mxu1 %v1381_v48 }
 0x126   : > { %1308 = vmatprep.subr.bf16.mxu1 %v1382_v49 }
 0x129   : > { %1316 = vmatpush3.bf16.msra.mxu1 %v1382_v49 }
 0x1df   : > { %v1255_v51 = vpop.f32.mrb[0].mxu1 }
 0x1e0   : > { %v636_v52 = vadd.f32 %v1255_v51, %v1054_v50  ;;  %v627_v53 = vpop.f32.mrb[1].mxu1 }
 0x1e1   : > { %v628_v54 = vadd.f32 %v1054_v50, %v627_v53  ;;  %v1256_v55 = vpop.f32.mrb[2].mxu1 }
 0x1e2   : > { %v639_v56 = vadd.f32 %v1256_v55, %v1054_v50  ;;  %v630_v57 = vpop.f32.mrb[3].mxu1  ;;  %v692_v59 = vmax.f32 %v636_v52, 0.0 }
 0x1e3   : > { %v631_v58 = vadd.f32 %v1054_v50, %v630_v57  ;;  %v690_v61 = vmax.f32 %v628_v54, 0.0 }
 0x1e4   : > { %v693_v60 = vmax.f32 %v639_v56, 0.0 }
 0x1e5   : > { %v691_v62 = vmax.f32 %v631_v58, 0.0 }
 0x1e6   : > { %v707_v63 = vpack.c.bf16 %v693_v60, %v692_v59 }
 0x1e7   : > { %v706_v0 = vpack.c.bf16 %v691_v62, %v690_v61  ;;  %v1259_v1 = vpop.f32.mrb[4].mxu1 }
 0x1e8   : > { %v652_v2 = vadd.f32 %v1259_v1, %v1054_v50  ;;  %v643_v3 = vpop.f32.mrb[5].mxu1 }
 0x1e9   : > { %v644_v4 = vadd.f32 %v1054_v50, %v643_v3  ;;  %v1260_v5 = vpop.f32.mrb[6].mxu1  ;;  %1285 = vmatprep.mubr.bf16.mxu0 %v706_v0 }
 0x1ea   : > { %v655_v6 = vadd.f32 %v1260_v5, %v1054_v50  ;;  %v646_v7 = vpop.f32.mrb[7].mxu1  ;;  %1286 = vmatmul.mubr.bf16.vlgmr.msra.gmra.mrb[16].mxu0 %v707_v63  ;;  %v696_v9 = vmax.f32 %v652_v2, 0.0 }
 0x1eb   : > { %v647_v8 = vadd.f32 %v1054_v50, %v646_v7  ;;  %v694_v11 = vmax.f32 %v644_v4, 0.0 }
 0x1ec   : > { %v697_v10 = vmax.f32 %v655_v6, 0.0 }
 0x1ed   : > { %v695_v12 = vmax.f32 %v647_v8, 0.0 }
 0x1ee   : > { %v709_v13 = vpack.c.bf16 %v697_v10, %v696_v9 }
 0x1ef   : > { %v708_v14 = vpack.c.bf16 %v695_v12, %v694_v11  ;;  %v1263_v15 = vpop.f32.mrb[8].mxu1 }
 0x1f0   : > { %v668_v16 = vadd.f32 %v1263_v15, %v1054_v50  ;;  %v659_v17 = vpop.f32.mrb[9].mxu1 }
 0x1f1   : > { %v660_v18 = vadd.f32 %v1054_v50, %v659_v17  ;;  %v1264_v19 = vpop.f32.mrb[10].mxu1  ;;  %1289 = vmatprep.mubr.bf16.mxu0 %v708_v14 }
 0x1f2   : > { %v671_v20 = vadd.f32 %v1264_v19, %v1054_v50  ;;  %v662_v21 = vpop.f32.mrb[11].mxu1  ;;  %1290 = vmatmul.mubr.bf16.gmra.mrb[20].mxu0 %v709_v13  ;;  %v700_v23 = vmax.f32 %v668_v16, 0.0 }
 0x1f3   : > { %v663_v22 = vadd.f32 %v1054_v50, %v662_v21  ;;  %v698_v25 = vmax.f32 %v660_v18, 0.0 }
 0x1f4   : > { %v701_v24 = vmax.f32 %v671_v20, 0.0 }
 0x1f5   : > { %v699_v26 = vmax.f32 %v663_v22, 0.0 }
 0x1f6   : > { %v711_v27 = vpack.c.bf16 %v701_v24, %v700_v23 }
 0x1f7   : > { %v710_v28 = vpack.c.bf16 %v699_v26, %v698_v25  ;;  %v1267_v29 = vpop.f32.mrb[12].mxu1 }
 0x1f8   : > { %v684_v30 = vadd.f32 %v1267_v29, %v1054_v50  ;;  %v675_v31 = vpop.f32.mrb[13].mxu1 }
 0x1f9   : > { %v676_v32 = vadd.f32 %v1054_v50, %v675_v31  ;;  %v1268_v33 = vpop.f32.mrb[14].mxu1  ;;  %1293 = vmatprep.mubr.bf16.mxu1 %v710_v28 }
 0x1fa   : > { %v687_v34 = vadd.f32 %v1268_v33, %v1054_v50  ;;  %v678_v35 = vpop.f32.mrb[15].mxu1  ;;  %1294 = vmatmul.mubr.bf16.vlgmr.msra.gmra.mrb[16].mxu1 %v711_v27  ;;  %v704_v37 = vmax.f32 %v684_v30, 0.0 }
 0x1fb   : > { %v679_v36 = vadd.f32 %v1054_v50, %v678_v35  ;;  %v702_v39 = vmax.f32 %v676_v32, 0.0 }
 0x1fc   : > { %v705_v38 = vmax.f32 %v687_v34, 0.0 }
 0x1fd   : > { %v703_v40 = vmax.f32 %v679_v36, 0.0 }
 0x1fe   : > { %v713_v41 = vpack.c.bf16 %v705_v38, %v704_v37 }
 0x1ff   : > { %v712_v42 = vpack.c.bf16 %v703_v40, %v702_v39 }
 0x201   : > { %1297 = vmatprep.mubr.bf16.mxu1 %v712_v42 }
 0x202   : > { %1298 = vmatmul.mubr.bf16.gmra.mrb[20].mxu1 %v713_v41 }
 0x2bd   : > { %v1287_v43 = vpop.f32.mrb[16].mxu0 }
 0x2be   : > { %v819_v45 = vpop.f32.mrb[17].mxu0  ;;  %v828_v47 = vadd.f32 %v1287_v43, %v1063_v44 }
 0x2bf   : > { %v1288_v46 = vpop.f32.mrb[18].mxu0  ;;  %v820_v50 = vadd.f32 %v1063_v44, %v819_v45 }
 0x2c0   : > { %v831_v48 = vadd.f32 %v1288_v46, %v1063_v44  ;;  %v822_v49 = vpop.f32.mrb[19].mxu0 }
 0x2c1   : > { %v823_v51 = vadd.f32 %v1063_v44, %v822_v49 }
 0x2c2   : > { %v1118_v52 = vpack.c.bf16 %v831_v48, %v828_v47 }
 0x2c3   : > { %v1113_v53 = vpack.c.bf16 %v823_v51, %v820_v50 }
 0x2c4   : > { %1150 = vst [vmem:[%s1689_s18 + $0x8] sm:$0xff] %v1118_v52  }
 0x2c5   : > { %1114 = vst [vmem:[%s1689_s18] sm:$0xff] %v1113_v53   ;;  %v1291_v54 = vpop.f32.mrb[20].mxu0 }
 0x2c6   : > { %v835_v55 = vpop.f32.mrb[21].mxu0  ;;  %v844_v57 = vadd.f32 %v1291_v54, %v1063_v44 }
 0x2c7   : > { %v1292_v56 = vpop.f32.mrb[22].mxu0  ;;  %v836_v60 = vadd.f32 %v1063_v44, %v835_v55 }
 0x2c8   : > { %v847_v58 = vadd.f32 %v1292_v56, %v1063_v44  ;;  %v838_v59 = vpop.f32.mrb[23].mxu0 }
 0x2c9   : > { %v839_v61 = vadd.f32 %v1063_v44, %v838_v59 }
 0x2ca   : > { %v1128_v62 = vpack.c.bf16 %v847_v58, %v844_v57 }
 0x2cb   : > { %v1123_v63 = vpack.c.bf16 %v839_v61, %v836_v60 }
 0x2cc   : > { %1152 = vst [vmem:[%s1689_s18 + $0x18] sm:$0xff] %v1128_v62  }
 0x2cd   : > { %1151 = vst [vmem:[%s1689_s18 + $0x10] sm:$0xff] %v1123_v63   ;;  %v1295_v0 = vpop.f32.mrb[16].mxu1 }
 0x2ce   : > { %v851_v1 = vpop.f32.mrb[17].mxu1  ;;  %v860_v3 = vadd.f32 %v1295_v0, %v1063_v44 }
 0x2cf   : > { %v1296_v2 = vpop.f32.mrb[18].mxu1  ;;  %v852_v6 = vadd.f32 %v1063_v44, %v851_v1 }
 0x2d0   : > { %v863_v4 = vadd.f32 %v1296_v2, %v1063_v44  ;;  %v854_v5 = vpop.f32.mrb[19].mxu1 }
 0x2d1   : > { %v855_v7 = vadd.f32 %v1063_v44, %v854_v5 }
 0x2d2   : > { %v1138_v8 = vpack.c.bf16 %v863_v4, %v860_v3 }
 0x2d3   : > { %v1133_v9 = vpack.c.bf16 %v855_v7, %v852_v6 }
 0x2d4   : > { %1154 = vst [vmem:[%s1689_s18 + $0x28] sm:$0xff] %v1138_v8  }
 0x2d5   : > { %1153 = vst [vmem:[%s1689_s18 + $0x20] sm:$0xff] %v1133_v9   ;;  %v1299_v10 = vpop.f32.mrb[20].mxu1 }
 0x2d6   : > { %v867_v11 = vpop.f32.mrb[21].mxu1  ;;  %v876_v13 = vadd.f32 %v1299_v10, %v1063_v44 }
 0x2d7   : > { %v1300_v12 = vpop.f32.mrb[22].mxu1  ;;  %v868_v16 = vadd.f32 %v1063_v44, %v867_v11 }
 0x2d8   : > { %v879_v14 = vadd.f32 %v1300_v12, %v1063_v44  ;;  %v870_v15 = vpop.f32.mrb[23].mxu1 }
 0x2d9   : > { %v871_v17 = vadd.f32 %v1063_v44, %v870_v15 }
 0x2da   : > { %v1148_v18 = vpack.c.bf16 %v879_v14, %v876_v13 }
 0x2db   : > { %v1143_v19 = vpack.c.bf16 %v871_v17, %v868_v16 }
 0x2dc   : > { %1156 = vst [vmem:[%s1689_s18 + $0x38] sm:$0xff] %v1148_v18  }
 0x2dd   : > { %1155 = vst [vmem:[%s1689_s18 + $0x30] sm:$0xff] %v1143_v19  }
 0x2de   : > { %1396 = shalt.err (!%p1393_p3)
}
 0x2df   : > { %s1397_s14 = scalar_lea.hbm %s1702_s23, 1024  ;;  %s1401_s17 = scalar_lea.hbm %s1758_s7, 2048 }
 0x2e0   : > { %p1398_p4 = scmp.ne.s32.totalorder %s1702_s23, %s1397_s14  ;;  %p1402_p9 = scmp.lt.u32.totalorder %s1702_s23, %s1758_s7 }
 0x2e1   : > { %p1403_p10 = scmp.lt.u32.totalorder %s1401_s17, %s1397_s14  ;;  %p1405_p12 = scmp.lt.u32.totalorder %s1397_s14, %s1702_s23 }
 0x2e2   : > { %p1399_p7 = pnand %p1398_p4, %p1529_p5 }
 0x2e3   : > { %p1404_p11 = por %p1403_p10, %p1402_p9 }
 0x2e4   : > { %p1400_p8 = pneg %p1399_p7 }
 0x2e5   : > { %p1406_p13 = por %p1405_p12, %p1404_p11 }
 0x2e7   : > { %p1407_p0 = pnand %p1406_p13, %p1400_p8 }
 0x2e9   : > { %1410 = shalt.err (!%p1407_p0)
}
 0x2ea   : > { %s1449_s21 = smov 64   ;;  %s1450_s22 = smov 4  }
 0x2eb   : > { %1317 = dma.vmem_to_hbm [thread:$0]  (%p1529_p5), %s1704_s20, 1024, %s1702_s23, %s1710_s28, %s1449_s21, %s1449_s21, %s1450_s22  }
 0x2ec PF: > { %p1323_p1 = scmp.ge.s32.totalorder %s1445_s27, 2  ;;  %s991_s29 = sand.u32 1, %s1433_s24  }
 0x2ed   : > { %s992_s8 = scalar_lea.sflag [#allocation4], %s991_s29 }
 0x2ee   : > { %p1320_p2 = pnand %p1323_p1, %p1533_p6 }
 0x2f0   : > { %1428 = dma.done.wait (!%p1320_p2), %s992_s8, 1024  }
 0x2f1   : > { %1430 = vsyncadd (!%p1320_p2), %s992_s8, 4294966272  ;;  %p17_p3 = scmp.ge.s32.totalorder %s1516_s30, 4   ;;  %s1761_s24 = smov %s1437_s25 }
 0x2f2   : > { %s1762_s25 = smov %s1441_s26  ;;  %s1763_s26 = smov %s1527_s10 }
 0x2f3   : > { %s1764_s27 = smov %s1516_s30  ;;  %19 = sbr.rel (!%p17_p3) target bundleno = 3 (0x3), region = 83 }
 0x2fa   :  { %997 = vsyncpa [#allocation4], 1 }
 0x2fb   :  { %999 = vsyncpa [#allocation4 + $0x1], 1 }

// kernel: tpu_custom_call.1
= control target key start
LH: loop header
LB: loop body
LE: loop exit
PB: predicated region body
PF: predicated region fallthrough
CT: control target
= control target key end

     0   :  { %12 = vsyncpa [#allocation4], 0  ;;  %s1751_s0 = inlined_call_operand.vmem [shape: f32[256,5], index: 0, kind: input, shape index: {}]   ;;  %s1752_s1 = inlined_call_operand.vmem [shape: bf16[128,128], index: 1, kind: input, shape index: {}]   ;;  %s1753_s2 = inlined_call_operand.vmem [shape: f32[1,128], index: 2, kind: input, shape index: {}]   ;;  %s1754_s3 = inlined_call_operand.vmem [shape: bf16[128,128], index: 3, kind: input, shape index: {}]   ;;  %s1755_s4 = inlined_call_operand.vmem [shape: f32[1,128], index: 4, kind: input, shape index: {}]   ;;  %s1756_s5 = inlined_call_operand.vmem [shape: bf16[128,128], index: 5, kind: input, shape index: {}]   ;;  %s1757_s6 = inlined_call_operand.vmem [shape: f32[1,128], index: 6, kind: input, shape index: {}]   ;;  %s1758_s7 = inlined_call_operand.hbm [shape: bf16[256,128], index: 7, kind: output, shape index: {}]  }
   0x1   :  { %14 = vsyncpa [#allocation4 + $0x1], 0  ;;  %s1491_s24 = smov 0   ;;  %s1493_s25 = smov 0  }
   0x2   :  { %s1495_s26 = smov 0   ;;  %s1497_s27 = smov 0  }
   0x3 LB: > { %s1512_s28 = sadd.s32 4294967295, %s1445_s27   ;;  %s1038_s29 = sadd.s32 4294967294, %s1445_s27   ;;  %s1445_s27 = sphi %s1497_s27, %s1764_s27   ;;  %s1441_s26 = sphi %s1495_s26, %s1763_s26   ;;  %s1437_s25 = sphi %s1493_s25, %s1762_s25   ;;  %s1433_s24 = sphi %s1491_s24, %s1761_s24  }
   0x4   : > { %s1516_s30 = sadd.s32 1, %s1445_s27   ;;  %s179_s8 = sadd.s32 1, %s1441_s26 }
   0x5   : > { %s176_s9 = ssub.s32 %s1445_s27, %s1516_s30  ;;  %p189_p0 = scmp.ne.s32.totalorder %s1441_s26, %s1437_s25 }
   0x6   : > { %p177_p1 = scmp.eq.s32.totalorder %s176_s9, 0  ;;  %p190_p2 = scmp.eq.s32.totalorder %s1512_s28, 1 }
   0x7   : > { %p195_p3 = scmp.ne.s32.totalorder %s1437_s25, %s1433_s24  ;;  %p196_p4 = scmp.eq.s32.totalorder %s1038_s29, 1 }
   0x8   : > { %s1527_s10 = scalar_select %p177_p1, %s1441_s26, %s179_s8  }
   0x9   : > { %p1529_p5 = por %p190_p2, %p189_p0  ;;  %p1533_p6 = por %p196_p4, %p195_p3 }
   0xa   : > { %p1041_p7 = scmp.ge.s32.totalorder %s1445_s27, 1  ;;  %p241_p8 = scmp.lt.s32.totalorder %s1445_s27, 3 }
   0xc   : > { %p242_p9 = pnand %p1041_p7, %p241_p8 }
   0xd   : > { %v1359_v0 = vld [vmem:[%s1752_s1] sm:$0xff] (!%p242_p9)   ;;  %s1043_s15 = sshll.u32 (!%p242_p9), %s1512_s28, 4  ;;  %v1360_v1 = vld [vmem:[%s1752_s1 + $0x8] sm:$0xff] (!%p242_p9)   ;;  %v1447_v2 = vmov (!%p242_p9), 0   ;;  %v1361_v3 = vld [vmem:[%s1752_s1 + $0x10] sm:$0xff] (!%p242_p9)   ;;  %vm313_vm0 = vcmask (!%p242_p9), 39936  }
   0xe   : > { %245 = sbr.rel (%p242_p9) target bundleno = 748 (0x2ec), region = 48  ;;  %p274_p10 = scmp.lt.s32.totalorder (!%p242_p9), %s1043_s15, 31  ;;  %1205 = vmatprep.subr.bf16.mxu0 (!%p242_p9), %v1359_v0  ;;  %281 = vst [vmem:[#allocation2] sm:$0xff] (!%p242_p9), %v1447_v2  ;;  %282 = vst [vmem:[#allocation2 + $0x8] sm:$0xff] (!%p242_p9), %v1447_v2  ;;  %v1362_v4 = vld [vmem:[%s1752_s1 + $0x18] sm:$0xff] (!%p242_p9)   ;;  %v1363_v12 = vld [vmem:[%s1752_s1 + $0x20] sm:$0xff] (!%p242_p9)  }
   0xf   : > { %1206 = vmatpush3.bf16.msra.mxu0 (!%p242_p9), %v1359_v0  ;;  %283 = vst [vmem:[#allocation2 + $0x10] sm:$0xff] (!%p242_p9), %v1447_v2  ;;  %284 = vst [vmem:[#allocation2 + $0x18] sm:$0xff] (!%p242_p9), %v1447_v2  ;;  %v1367_v30 = vld [vmem:[%s1754_s3] sm:$0xff] (!%p242_p9)   ;;  %v1368_v31 = vld [vmem:[%s1754_s3 + $0x8] sm:$0xff] (!%p242_p9)   ;;  %s270_s14 = sand.u32 (!%p242_p9), 1, %s1437_s25   ;;  %s1109_s19 = sshll.u32 (!%p242_p9), %s1512_s28, 10 }
  0x10   : > { %285 = vst [vmem:[#allocation2 + $0x20] sm:$0xff] (!%p242_p9), %v1447_v2  ;;  %286 = vst [vmem:[#allocation2 + $0x28] sm:$0xff] (!%p242_p9), %v1447_v2  ;;  %1207 = vmatprep.subr.bf16.mxu0 (!%p242_p9), %v1360_v1  ;;  %v1364_v32 = vld [vmem:[%s1752_s1 + $0x28] sm:$0xff] (!%p242_p9)   ;;  %1237 = vmatprep.subr.bf16.mxu1 (!%p242_p9), %v1367_v30  ;;  %v1369_v34 = vld [vmem:[%s1754_s3 + $0x10] sm:$0xff] (!%p242_p9)   ;;  %s1042_s17 = sshll.u32 (!%p242_p9), %s270_s14, 6  ;;  %s1710_s28 = scalar_lea.sflag (!%p242_p9), [#allocation4], %s270_s14 }
  0x11   : > { %287 = vst [vmem:[#allocation2 + $0x30] sm:$0xff] (!%p242_p9), %v1447_v2  ;;  %288 = vst [vmem:[#allocation2 + $0x38] sm:$0xff] (!%p242_p9), %v1447_v2  ;;  %1238 = vmatpush3.bf16.msra.mxu1 (!%p242_p9), %v1367_v30  ;;  %v1365_v35 = vld [vmem:[%s1752_s1 + $0x30] sm:$0xff] (!%p242_p9)   ;;  %v1370_v36 = vld [vmem:[%s1754_s3 + $0x18] sm:$0xff] (!%p242_p9)   ;;  %s1689_s18 = scalar_lea.vmem (!%p242_p9), [#allocation3], %s1042_s17  ;;  %s1448_s8 = smov (!%p242_p9), [#allocation3]  }
  0x12   : > { %1239 = vmatprep.subr.bf16.mxu1 (!%p242_p9), %v1368_v31  ;;  %v1366_v37 = vld [vmem:[%s1752_s1 + $0x38] sm:$0xff] (!%p242_p9)   ;;  %v1371_v38 = vld [vmem:[%s1754_s3 + $0x20] sm:$0xff] (!%p242_p9)   ;;  %v1372_v39 = vld [vmem:[%s1754_s3 + $0x28] sm:$0xff] (!%p242_p9)   ;;  %s1387_s9 = sshll.u32 (!%p242_p9), %s1448_s8, 4  ;;  %s1388_s9 = int_to_ptr.vmem [resolvable:$false] %s1387_s9 }
  0x13   : > { %1208 = vmatpush3.bf16.msra.mxu0 (!%p242_p9), %v1360_v1  ;;  %v1373_v47 = vld [vmem:[%s1754_s3 + $0x30] sm:$0xff] (!%p242_p9)   ;;  %v1374_v48 = vld [vmem:[%s1754_s3 + $0x38] sm:$0xff] (!%p242_p9)   ;;  %v1375_v49 = vld [vmem:[%s1756_s5] sm:$0xff] (!%p242_p9)   ;;  %s1389_s13 = scalar_lea.vmem (!%p242_p9), %s1388_s9, 2048 }
  0x14   : > { %1209 = vmatprep.subr.bf16.mxu0 (!%p242_p9), %v1361_v3  ;;  %v1376_v50 = vld [vmem:[%s1756_s5 + $0x8] sm:$0xff] (!%p242_p9)   ;;  %v1377_v51 = vld [vmem:[%s1756_s5 + $0x10] sm:$0xff] (!%p242_p9)   ;;  %v1629_v52 = vld [vmem:[%s1756_s5 + $0x18] sm:$0xff] (!%p242_p9)  }
  0x15   : > { %s1766_s15 = smov (!%p274_p10, %s1043_s15), 31  ;;  %1240 = vmatpush3.bf16.msra.mxu1 %v1368_v31  ;;  %v1635_v53 = vld [vmem:[%s1756_s5 + $0x20] sm:$0xff]   ;;  %v1642_v54 = vld [vmem:[%s1756_s5 + $0x28] sm:$0xff]  }
  0x16   : > { %s1044_s20 = sshll.u32 %s1766_s15, 3  ;;  %1241 = vmatprep.subr.bf16.mxu1 %v1369_v34  ;;  %v1650_v55 = vld [vmem:[%s1753_s2] ss:$0 sm:$0xff] }
  0x17   : > { %s1552_s23 = scalar_lea.vmem %s1751_s0, %s1044_s20  ;;  %1210 = vmatpush3.bf16.msra.mxu0 %v1361_v3  ;;  %s976_s20 = sshll.u32 %s1689_s18, 4  ;;  %s1704_s20 = int_to_ptr.vmem [resolvable:$true] %s976_s20 }
  0x18   : > { %v289_v5 = vld [vmem:[%s1552_s23] sm:$0xff]  ;;  %v290_v6 = vld [vmem:[%s1552_s23 + $0x8] sm:$0xff]  ;;  %v291_v7 = vld [vmem:[%s1552_s23 + $0x10] sm:$0xff]  ;;  %1211 = vmatprep.subr.bf16.mxu0 %v1362_v4  ;;  %s1383_s29 = scalar_lea.vmem %s1704_s20, 1024  ;;  %p1390_p0 = scmp.lt.s32.totalorder %s1704_s20, %s1388_s9 }
  0x19   : > { %v305_v8 = vpack.c.bf16 %v290_v6, %v289_v5  ;;  %v292_v9 = vld [vmem:[%s1552_s23 + $0x18] sm:$0xff]  ;;  %v293_v10 = vld [vmem:[%s1552_s23 + $0x20] sm:$0xff]  ;;  %v294_v11 = vld [vmem:[%s1552_s23 + $0x28] sm:$0xff]  ;;  %1242 = vmatpush3.bf16.msra.mxu1 %v1369_v34  ;;  %p1384_p11 = scmp.ne.s32.totalorder %s1704_s20, %s1383_s29  ;;  %p1391_p1 = scmp.lt.s32.totalorder %s1389_s13, %s1383_s29 }
  0x1a   : > { %v306_v13 = vpack.c.bf16 %v292_v9, %v291_v7  ;;  %v307_v14 = vpack.c.bf16 %v294_v11, %v293_v10  ;;  %v295_v15 = vld [vmem:[%s1552_s23 + $0x30] sm:$0xff]  ;;  %v296_v16 = vld [vmem:[%s1552_s23 + $0x38] sm:$0xff]  ;;  %v297_v17 = vld [vmem:[%s1552_s23 + $0x40] sm:$0xff]  ;;  %1243 = vmatprep.subr.bf16.mxu1 %v1370_v36 }
  0x1b   : > { %314 = vst.msk [vmem:[#allocation2] sm:$0xff] %vm313_vm0, %v305_v8  ;;  %v308_v18 = vpack.c.bf16 %v296_v16, %v295_v15  ;;  %v298_v19 = vld [vmem:[%s1552_s23 + $0x48] sm:$0xff]  ;;  %v299_v20 = vld [vmem:[%s1552_s23 + $0x50] sm:$0xff]  ;;  %v300_v21 = vld [vmem:[%s1552_s23 + $0x58] sm:$0xff]  ;;  %1212 = vmatpush3.bf16.msra.mxu0 %v1362_v4  ;;  %p1385_p12 = pnand %p1384_p11, %p1529_p5  ;;  %p1392_p2 = por %p1391_p1, %p1390_p0 }
  0x1c   : > { %315 = vst.msk [vmem:[#allocation2 + $0x8] sm:$0xff] %vm313_vm0, %v306_v13  ;;  %316 = vst.msk [vmem:[#allocation2 + $0x10] sm:$0xff] %vm313_vm0, %v307_v14  ;;  %v309_v22 = vpack.c.bf16 %v298_v19, %v297_v17  ;;  %v310_v23 = vpack.c.bf16 %v300_v21, %v299_v20  ;;  %v301_v24 = vld [vmem:[%s1552_s23 + $0x60] sm:$0xff]  ;;  %v302_v25 = vld [vmem:[%s1552_s23 + $0x68] sm:$0xff]  ;;  %1213 = vmatprep.subr.bf16.mxu0 %v1363_v12 }
  0x1d   : > { %v303_v26 = vld [vmem:[%s1552_s23 + $0x70] sm:$0xff]  ;;  %317 = vst.msk [vmem:[#allocation2 + $0x18] sm:$0xff] %vm313_vm0, %v308_v18  ;;  %v311_v27 = vpack.c.bf16 %v302_v25, %v301_v24  ;;  %v304_v28 = vld [vmem:[%s1552_s23 + $0x78] sm:$0xff]  ;;  %1244 = vmatpush3.bf16.msra.mxu1 %v1370_v36  ;;  %s1702_s23 = scalar_lea.hbm %s1758_s7, %s1109_s19  ;;  %p1386_p13 = pneg %p1385_p12 }
  0x1e   : > { %318 = vst.msk [vmem:[#allocation2 + $0x20] sm:$0xff] %vm313_vm0, %v309_v22  ;;  %319 = vst.msk [vmem:[#allocation2 + $0x28] sm:$0xff] %vm313_vm0, %v310_v23  ;;  %v312_v29 = vpack.c.bf16 %v304_v28, %v303_v26  ;;  %1245 = vmatprep.subr.bf16.mxu1 %v1371_v38 }
  0x1f   : > { %320 = vst.msk [vmem:[#allocation2 + $0x30] sm:$0xff] %vm313_vm0, %v311_v27  ;;  %1214 = vmatpush3.bf16.msra.mxu0 %v1363_v12  ;;  %p1393_p3 = pnand %p1392_p2, %p1386_p13 }
  0x20   : > { %321 = vst.msk [vmem:[#allocation2 + $0x38] sm:$0xff] %vm313_vm0, %v312_v29  ;;  %1215 = vmatprep.subr.bf16.mxu0 %v1364_v32 }
  0x21   : > { %1246 = vmatpush3.bf16.msra.mxu1 %v1371_v38 }
  0x22   : > { %v322_v33 = vld [vmem:[#allocation2] sm:$0xff]  ;;  %1247 = vmatprep.subr.bf16.mxu1 %v1372_v39 }
  0x23   : > { %1221 = vmatprep.mubr.bf16.mxu0 %v322_v33  ;;  %1216 = vmatpush3.bf16.msra.mxu0 %v1364_v32  ;;  %v323_v40 = vld [vmem:[#allocation2 + $0x8] sm:$0xff]  ;;  %v324_v41 = vld [vmem:[#allocation2 + $0x10] sm:$0xff] }
  0x24   : > { %1217 = vmatprep.subr.bf16.mxu0 %v1365_v35  ;;  %v325_v42 = vld [vmem:[#allocation2 + $0x18] sm:$0xff] }
  0x25   : > { %1248 = vmatpush3.bf16.msra.mxu1 %v1372_v39  ;;  %v326_v43 = vld [vmem:[#allocation2 + $0x20] sm:$0xff]  ;;  %v327_v44 = vld [vmem:[#allocation2 + $0x28] sm:$0xff] }
  0x26   : > { %v328_v45 = vld [vmem:[#allocation2 + $0x30] sm:$0xff]  ;;  %1249 = vmatprep.subr.bf16.mxu1 %v1373_v47 }
  0x27   : > { %1218 = vmatpush3.bf16.msra.mxu0 %v1365_v35  ;;  %v329_v46 = vld [vmem:[#allocation2 + $0x38] sm:$0xff] }
  0x28   : > { %1219 = vmatprep.subr.bf16.mxu0 %v1366_v37 }
  0x29   : > { %1250 = vmatpush3.bf16.msra.mxu1 %v1373_v47 }
  0x2a   : > { %1251 = vmatprep.subr.bf16.mxu1 %v1374_v48 }
  0x2b   : > { %1220 = vmatpush3.bf16.msra.mxu0 %v1366_v37 }
  0x2c   : > { %1269 = vmatprep.subr.bf16.mxu0 %v1375_v49 }
  0x2d   : > { %1252 = vmatpush3.bf16.msra.mxu1 %v1374_v48  ;;  %v1381_v48 = vld [vmem:[%s1756_s5 + $0x30] sm:$0xff]  }
  0x2e   : > { %1222 = vmatmul.mubr.bf16.vlgmr.msra.gmra.mrb[0].mxu0 %v323_v40  ;;  %1301 = vmatprep.subr.bf16.mxu1 %v1375_v49 }
  0x2f   : > { %1225 = vmatprep.mubr.bf16.mxu0 %v324_v41  ;;  %1270 = vmatpush3.bf16.msra.mxu0 %v1375_v49 }
  0x30   : > { %1271 = vmatprep.subr.bf16.mxu0 %v1376_v50 }
  0x33   : > { %1272 = vmatpush3.bf16.msra.mxu0 %v1376_v50 }
  0x34   : > { %1273 = vmatprep.subr.bf16.mxu0 %v1377_v51 }
  0x36   : > { %1226 = vmatmul.mubr.bf16.gmra.mrb[4].mxu0 %v325_v42 }
  0x37   : > { %1229 = vmatprep.mubr.bf16.mxu0 %v326_v43  ;;  %1274 = vmatpush3.bf16.msra.mxu0 %v1377_v51 }
  0x38   : > { %1275 = vmatprep.subr.bf16.mxu0 %v1629_v52 }
  0x3b   : > { %1276 = vmatpush3.bf16.msra.mxu0 %v1629_v52 }
  0x3c   : > { %1277 = vmatprep.subr.bf16.mxu0 %v1635_v53 }
  0x3e   : > { %1230 = vmatmul.mubr.bf16.gmra.mrb[8].mxu0 %v327_v44 }
  0x3f   : > { %1233 = vmatprep.mubr.bf16.mxu0 %v328_v45  ;;  %1278 = vmatpush3.bf16.msra.mxu0 %v1635_v53 }
  0x40   : > { %1279 = vmatprep.subr.bf16.mxu0 %v1642_v54 }
  0x43   : > { %1280 = vmatpush3.bf16.msra.mxu0 %v1642_v54 }
  0x44   : > { %1281 = vmatprep.subr.bf16.mxu0 %v1381_v48 }
  0x46   : > { %1234 = vmatmul.mubr.bf16.gmra.mrb[12].mxu0 %v329_v46 }
  0x47   : > { %1282 = vmatpush3.bf16.msra.mxu0 %v1381_v48 }
 0x101   : > { %v1223_v56 = vpop.f32.mrb[0].mxu0 }
 0x102   : > { %v444_v57 = vadd.f32 %v1223_v56, %v1650_v55  ;;  %v435_v58 = vpop.f32.mrb[1].mxu0 }
 0x103   : > { %v436_v59 = vadd.f32 %v1650_v55, %v435_v58  ;;  %v1224_v60 = vpop.f32.mrb[2].mxu0 }
 0x104   : > { %v447_v61 = vadd.f32 %v1224_v60, %v1650_v55  ;;  %v438_v62 = vpop.f32.mrb[3].mxu0  ;;  %v500_v0 = vmax.f32 %v444_v57, 0.0 }
 0x105   : > { %v439_v63 = vadd.f32 %v1650_v55, %v438_v62  ;;  %v498_v2 = vmax.f32 %v436_v59, 0.0 }
 0x106   : > { %v501_v1 = vmax.f32 %v447_v61, 0.0 }
 0x107   : > { %v499_v3 = vmax.f32 %v439_v63, 0.0 }
 0x108   : > { %v515_v4 = vpack.c.bf16 %v501_v1, %v500_v0 }
 0x109   : > { %v1227_v5 = vpop.f32.mrb[4].mxu0  ;;  %v514_v6 = vpack.c.bf16 %v499_v3, %v498_v2 }
 0x10a   : > { %v460_v7 = vadd.f32 %v1227_v5, %v1650_v55  ;;  %v451_v8 = vpop.f32.mrb[5].mxu0 }
 0x10b   : > { %v452_v9 = vadd.f32 %v1650_v55, %v451_v8  ;;  %v1228_v10 = vpop.f32.mrb[6].mxu0  ;;  %1253 = vmatprep.mubr.bf16.mxu1 %v514_v6 }
 0x10c   : > { %v463_v11 = vadd.f32 %v1228_v10, %v1650_v55  ;;  %v454_v12 = vpop.f32.mrb[7].mxu0  ;;  %1254 = vmatmul.mubr.bf16.vlgmr.msra.gmra.mrb[0].mxu1 %v515_v4  ;;  %v504_v14 = vmax.f32 %v460_v7, 0.0 }
 0x10d   : > { %v455_v13 = vadd.f32 %v1650_v55, %v454_v12  ;;  %1309 = vmatpush3.bf16.msra.mxu1 %v1375_v49  ;;  %v502_v16 = vmax.f32 %v452_v9, 0.0  ;;  %v1382_v49 = vld [vmem:[%s1756_s5 + $0x38] sm:$0xff]  }
 0x10e   : > { %v505_v15 = vmax.f32 %v463_v11, 0.0  ;;  %1302 = vmatprep.subr.bf16.mxu1 %v1376_v50  ;;  %1283 = vmatprep.subr.bf16.mxu0 %v1382_v49 }
 0x10f   : > { %v503_v17 = vmax.f32 %v455_v13, 0.0  ;;  %1284 = vmatpush3.bf16.msra.mxu0 %v1382_v49 }
 0x110   : > { %v517_v18 = vpack.c.bf16 %v505_v15, %v504_v14 }
 0x111   : > { %v516_v19 = vpack.c.bf16 %v503_v17, %v502_v16  ;;  %v1231_v20 = vpop.f32.mrb[8].mxu0  ;;  %1310 = vmatpush3.bf16.msra.mxu1 %v1376_v50  ;;  %v1054_v50 = vld [vmem:[%s1755_s4] ss:$0 sm:$0xff] }
 0x112   : > { %v476_v21 = vadd.f32 %v1231_v20, %v1650_v55  ;;  %v467_v22 = vpop.f32.mrb[9].mxu0  ;;  %1303 = vmatprep.subr.bf16.mxu1 %v1377_v51 }
 0x113   : > { %v468_v23 = vadd.f32 %v1650_v55, %v467_v22  ;;  %v1232_v24 = vpop.f32.mrb[10].mxu0  ;;  %1257 = vmatprep.mubr.bf16.mxu1 %v516_v19 }
 0x114   : > { %v479_v25 = vadd.f32 %v1232_v24, %v1650_v55  ;;  %v470_v26 = vpop.f32.mrb[11].mxu0  ;;  %1258 = vmatmul.mubr.bf16.gmra.mrb[4].mxu1 %v517_v18  ;;  %v508_v28 = vmax.f32 %v476_v21, 0.0 }
 0x115   : > { %v471_v27 = vadd.f32 %v1650_v55, %v470_v26  ;;  %1311 = vmatpush3.bf16.msra.mxu1 %v1377_v51  ;;  %v506_v30 = vmax.f32 %v468_v23, 0.0 }
 0x116   : > { %v509_v29 = vmax.f32 %v479_v25, 0.0  ;;  %1304 = vmatprep.subr.bf16.mxu1 %v1629_v52 }
 0x117   : > { %v507_v31 = vmax.f32 %v471_v27, 0.0 }
 0x118   : > { %v519_v32 = vpack.c.bf16 %v509_v29, %v508_v28 }
 0x119   : > { %v518_v33 = vpack.c.bf16 %v507_v31, %v506_v30  ;;  %v1235_v34 = vpop.f32.mrb[12].mxu0  ;;  %1312 = vmatpush3.bf16.msra.mxu1 %v1629_v52 }
 0x11a   : > { %v492_v35 = vadd.f32 %v1235_v34, %v1650_v55  ;;  %v483_v36 = vpop.f32.mrb[13].mxu0  ;;  %1305 = vmatprep.subr.bf16.mxu1 %v1635_v53 }
 0x11b   : > { %v484_v37 = vadd.f32 %v1650_v55, %v483_v36  ;;  %v1236_v38 = vpop.f32.mrb[14].mxu0  ;;  %1261 = vmatprep.mubr.bf16.mxu1 %v518_v33 }
 0x11c   : > { %v495_v39 = vadd.f32 %v1236_v38, %v1650_v55  ;;  %v486_v40 = vpop.f32.mrb[15].mxu0  ;;  %1262 = vmatmul.mubr.bf16.gmra.mrb[8].mxu1 %v519_v32  ;;  %v512_v42 = vmax.f32 %v492_v35, 0.0 }
 0x11d   : > { %v487_v41 = vadd.f32 %v1650_v55, %v486_v40  ;;  %1313 = vmatpush3.bf16.msra.mxu1 %v1635_v53  ;;  %v510_v44 = vmax.f32 %v484_v37, 0.0 }
 0x11e   : > { %v513_v43 = vmax.f32 %v495_v39, 0.0  ;;  %1306 = vmatprep.subr.bf16.mxu1 %v1642_v54 }
 0x11f   : > { %v511_v45 = vmax.f32 %v487_v41, 0.0 }
 0x120   : > { %v521_v46 = vpack.c.bf16 %v513_v43, %v512_v42 }
 0x121   : > { %v520_v47 = vpack.c.bf16 %v511_v45, %v510_v44  ;;  %1314 = vmatpush3.bf16.msra.mxu1 %v1642_v54  ;;  %v1063_v44 = vld [vmem:[%s1757_s6] ss:$0 sm:$0xff] }
 0x122   : > { %1307 = vmatprep.subr.bf16.mxu1 %v1381_v48 }
 0x123   : > { %1265 = vmatprep.mubr.bf16.mxu1 %v520_v47 }
 0x124   : > { %1266 = vmatmul.mubr.bf16.gmra.mrb[12].mxu1 %v521_v46 }
 0x125   : > { %1315 = vmatpush3.bf16.msra.mxu1 %v1381_v48 }
 0x126   : > { %1308 = vmatprep.subr.bf16.mxu1 %v1382_v49 }
 0x129   : > { %1316 = vmatpush3.bf16.msra.mxu1 %v1382_v49 }
 0x1df   : > { %v1255_v51 = vpop.f32.mrb[0].mxu1 }
 0x1e0   : > { %v636_v52 = vadd.f32 %v1255_v51, %v1054_v50  ;;  %v627_v53 = vpop.f32.mrb[1].mxu1 }
 0x1e1   : > { %v628_v54 = vadd.f32 %v1054_v50, %v627_v53  ;;  %v1256_v55 = vpop.f32.mrb[2].mxu1 }
 0x1e2   : > { %v639_v56 = vadd.f32 %v1256_v55, %v1054_v50  ;;  %v630_v57 = vpop.f32.mrb[3].mxu1  ;;  %v692_v59 = vmax.f32 %v636_v52, 0.0 }
 0x1e3   : > { %v631_v58 = vadd.f32 %v1054_v50, %v630_v57  ;;  %v690_v61 = vmax.f32 %v628_v54, 0.0 }
 0x1e4   : > { %v693_v60 = vmax.f32 %v639_v56, 0.0 }
 0x1e5   : > { %v691_v62 = vmax.f32 %v631_v58, 0.0 }
 0x1e6   : > { %v707_v63 = vpack.c.bf16 %v693_v60, %v692_v59 }
 0x1e7   : > { %v706_v0 = vpack.c.bf16 %v691_v62, %v690_v61  ;;  %v1259_v1 = vpop.f32.mrb[4].mxu1 }
 0x1e8   : > { %v652_v2 = vadd.f32 %v1259_v1, %v1054_v50  ;;  %v643_v3 = vpop.f32.mrb[5].mxu1 }
 0x1e9   : > { %v644_v4 = vadd.f32 %v1054_v50, %v643_v3  ;;  %v1260_v5 = vpop.f32.mrb[6].mxu1  ;;  %1285 = vmatprep.mubr.bf16.mxu0 %v706_v0 }
 0x1ea   : > { %v655_v6 = vadd.f32 %v1260_v5, %v1054_v50  ;;  %v646_v7 = vpop.f32.mrb[7].mxu1  ;;  %1286 = vmatmul.mubr.bf16.vlgmr.msra.gmra.mrb[16].mxu0 %v707_v63  ;;  %v696_v9 = vmax.f32 %v652_v2, 0.0 }
 0x1eb   : > { %v647_v8 = vadd.f32 %v1054_v50, %v646_v7  ;;  %v694_v11 = vmax.f32 %v644_v4, 0.0 }
 0x1ec   : > { %v697_v10 = vmax.f32 %v655_v6, 0.0 }
 0x1ed   : > { %v695_v12 = vmax.f32 %v647_v8, 0.0 }
 0x1ee   : > { %v709_v13 = vpack.c.bf16 %v697_v10, %v696_v9 }
 0x1ef   : > { %v708_v14 = vpack.c.bf16 %v695_v12, %v694_v11  ;;  %v1263_v15 = vpop.f32.mrb[8].mxu1 }
 0x1f0   : > { %v668_v16 = vadd.f32 %v1263_v15, %v1054_v50  ;;  %v659_v17 = vpop.f32.mrb[9].mxu1 }
 0x1f1   : > { %v660_v18 = vadd.f32 %v1054_v50, %v659_v17  ;;  %v1264_v19 = vpop.f32.mrb[10].mxu1  ;;  %1289 = vmatprep.mubr.bf16.mxu0 %v708_v14 }
 0x1f2   : > { %v671_v20 = vadd.f32 %v1264_v19, %v1054_v50  ;;  %v662_v21 = vpop.f32.mrb[11].mxu1  ;;  %1290 = vmatmul.mubr.bf16.gmra.mrb[20].mxu0 %v709_v13  ;;  %v700_v23 = vmax.f32 %v668_v16, 0.0 }
 0x1f3   : > { %v663_v22 = vadd.f32 %v1054_v50, %v662_v21  ;;  %v698_v25 = vmax.f32 %v660_v18, 0.0 }
 0x1f4   : > { %v701_v24 = vmax.f32 %v671_v20, 0.0 }
 0x1f5   : > { %v699_v26 = vmax.f32 %v663_v22, 0.0 }
 0x1f6   : > { %v711_v27 = vpack.c.bf16 %v701_v24, %v700_v23 }
 0x1f7   : > { %v710_v28 = vpack.c.bf16 %v699_v26, %v698_v25  ;;  %v1267_v29 = vpop.f32.mrb[12].mxu1 }
 0x1f8   : > { %v684_v30 = vadd.f32 %v1267_v29, %v1054_v50  ;;  %v675_v31 = vpop.f32.mrb[13].mxu1 }
 0x1f9   : > { %v676_v32 = vadd.f32 %v1054_v50, %v675_v31  ;;  %v1268_v33 = vpop.f32.mrb[14].mxu1  ;;  %1293 = vmatprep.mubr.bf16.mxu1 %v710_v28 }
 0x1fa   : > { %v687_v34 = vadd.f32 %v1268_v33, %v1054_v50  ;;  %v678_v35 = vpop.f32.mrb[15].mxu1  ;;  %1294 = vmatmul.mubr.bf16.vlgmr.msra.gmra.mrb[16].mxu1 %v711_v27  ;;  %v704_v37 = vmax.f32 %v684_v30, 0.0 }
 0x1fb   : > { %v679_v36 = vadd.f32 %v1054_v50, %v678_v35  ;;  %v702_v39 = vmax.f32 %v676_v32, 0.0 }
 0x1fc   : > { %v705_v38 = vmax.f32 %v687_v34, 0.0 }
 0x1fd   : > { %v703_v40 = vmax.f32 %v679_v36, 0.0 }
 0x1fe   : > { %v713_v41 = vpack.c.bf16 %v705_v38, %v704_v37 }
 0x1ff   : > { %v712_v42 = vpack.c.bf16 %v703_v40, %v702_v39 }
 0x201   : > { %1297 = vmatprep.mubr.bf16.mxu1 %v712_v42 }
 0x202   : > { %1298 = vmatmul.mubr.bf16.gmra.mrb[20].mxu1 %v713_v41 }
 0x2bd   : > { %v1287_v43 = vpop.f32.mrb[16].mxu0 }
 0x2be   : > { %v819_v45 = vpop.f32.mrb[17].mxu0  ;;  %v828_v47 = vadd.f32 %v1287_v43, %v1063_v44 }
 0x2bf   : > { %v1288_v46 = vpop.f32.mrb[18].mxu0  ;;  %v820_v50 = vadd.f32 %v1063_v44, %v819_v45 }
 0x2c0   : > { %v831_v48 = vadd.f32 %v1288_v46, %v1063_v44  ;;  %v822_v49 = vpop.f32.mrb[19].mxu0 }
 0x2c1   : > { %v823_v51 = vadd.f32 %v1063_v44, %v822_v49 }
 0x2c2   : > { %v1118_v52 = vpack.c.bf16 %v831_v48, %v828_v47 }
 0x2c3   : > { %v1113_v53 = vpack.c.bf16 %v823_v51, %v820_v50 }
 0x2c4   : > { %1150 = vst [vmem:[%s1689_s18 + $0x8] sm:$0xff] %v1118_v52  }
 0x2c5   : > { %1114 = vst [vmem:[%s1689_s18] sm:$0xff] %v1113_v53   ;;  %v1291_v54 = vpop.f32.mrb[20].mxu0 }
 0x2c6   : > { %v835_v55 = vpop.f32.mrb[21].mxu0  ;;  %v844_v57 = vadd.f32 %v1291_v54, %v1063_v44 }
 0x2c7   : > { %v1292_v56 = vpop.f32.mrb[22].mxu0  ;;  %v836_v60 = vadd.f32 %v1063_v44, %v835_v55 }
 0x2c8   : > { %v847_v58 = vadd.f32 %v1292_v56, %v1063_v44  ;;  %v838_v59 = vpop.f32.mrb[23].mxu0 }
 0x2c9   : > { %v839_v61 = vadd.f32 %v1063_v44, %v838_v59 }
 0x2ca   : > { %v1128_v62 = vpack.c.bf16 %v847_v58, %v844_v57 }
 0x2cb   : > { %v1123_v63 = vpack.c.bf16 %v839_v61, %v836_v60 }
 0x2cc   : > { %1152 = vst [vmem:[%s1689_s18 + $0x18] sm:$0xff] %v1128_v62  }
 0x2cd   : > { %1151 = vst [vmem:[%s1689_s18 + $0x10] sm:$0xff] %v1123_v63   ;;  %v1295_v0 = vpop.f32.mrb[16].mxu1 }
 0x2ce   : > { %v851_v1 = vpop.f32.mrb[17].mxu1  ;;  %v860_v3 = vadd.f32 %v1295_v0, %v1063_v44 }
 0x2cf   : > { %v1296_v2 = vpop.f32.mrb[18].mxu1  ;;  %v852_v6 = vadd.f32 %v1063_v44, %v851_v1 }
 0x2d0   : > { %v863_v4 = vadd.f32 %v1296_v2, %v1063_v44  ;;  %v854_v5 = vpop.f32.mrb[19].mxu1 }
 0x2d1   : > { %v855_v7 = vadd.f32 %v1063_v44, %v854_v5 }
 0x2d2   : > { %v1138_v8 = vpack.c.bf16 %v863_v4, %v860_v3 }
 0x2d3   : > { %v1133_v9 = vpack.c.bf16 %v855_v7, %v852_v6 }
 0x2d4   : > { %1154 = vst [vmem:[%s1689_s18 + $0x28] sm:$0xff] %v1138_v8  }
 0x2d5   : > { %1153 = vst [vmem:[%s1689_s18 + $0x20] sm:$0xff] %v1133_v9   ;;  %v1299_v10 = vpop.f32.mrb[20].mxu1 }
 0x2d6   : > { %v867_v11 = vpop.f32.mrb[21].mxu1  ;;  %v876_v13 = vadd.f32 %v1299_v10, %v1063_v44 }
 0x2d7   : > { %v1300_v12 = vpop.f32.mrb[22].mxu1  ;;  %v868_v16 = vadd.f32 %v1063_v44, %v867_v11 }
 0x2d8   : > { %v879_v14 = vadd.f32 %v1300_v12, %v1063_v44  ;;  %v870_v15 = vpop.f32.mrb[23].mxu1 }
 0x2d9   : > { %v871_v17 = vadd.f32 %v1063_v44, %v870_v15 }
 0x2da   : > { %v1148_v18 = vpack.c.bf16 %v879_v14, %v876_v13 }
 0x2db   : > { %v1143_v19 = vpack.c.bf16 %v871_v17, %v868_v16 }
 0x2dc   : > { %1156 = vst [vmem:[%s1689_s18 + $0x38] sm:$0xff] %v1148_v18  }
 0x2dd   : > { %1155 = vst [vmem:[%s1689_s18 + $0x30] sm:$0xff] %v1143_v19  }
 0x2de   : > { %1396 = shalt.err (!%p1393_p3)
}
 0x2df   : > { %s1397_s14 = scalar_lea.hbm %s1702_s23, 1024  ;;  %s1401_s17 = scalar_lea.hbm %s1758_s7, 2048 }
 0x2e0   : > { %p1398_p4 = scmp.ne.s32.totalorder %s1702_s23, %s1397_s14  ;;  %p1402_p9 = scmp.lt.u32.totalorder %s1702_s23, %s1758_s7 }
 0x2e1   : > { %p1403_p10 = scmp.lt.u32.totalorder %s1401_s17, %s1397_s14  ;;  %p1405_p12 = scmp.lt.u32.totalorder %s1397_s14, %s1702_s23 }
 0x2e2   : > { %p1399_p7 = pnand %p1398_p4, %p1529_p5 }
 0x2e3   : > { %p1404_p11 = por %p1403_p10, %p1402_p9 }
 0x2e4   : > { %p1400_p8 = pneg %p1399_p7 }
 0x2e5   : > { %p1406_p13 = por %p1405_p12, %p1404_p11 }
 0x2e7   : > { %p1407_p0 = pnand %p1406_p13, %p1400_p8 }
 0x2e9   : > { %1410 = shalt.err (!%p1407_p0)
}
 0x2ea   : > { %s1449_s21 = smov 64   ;;  %s1450_s22 = smov 4  }
 0x2eb   : > { %1317 = dma.vmem_to_hbm [thread:$0]  (%p1529_p5), %s1704_s20, 1024, %s1702_s23, %s1710_s28, %s1449_s21, %s1449_s21, %s1450_s22  }
 0x2ec PF: > { %p1323_p1 = scmp.ge.s32.totalorder %s1445_s27, 2  ;;  %s991_s29 = sand.u32 1, %s1433_s24  }
 0x2ed   : > { %s992_s8 = scalar_lea.sflag [#allocation4], %s991_s29 }
 0x2ee   : > { %p1320_p2 = pnand %p1323_p1, %p1533_p6 }
 0x2f0   : > { %1428 = dma.done.wait (!%p1320_p2), %s992_s8, 1024  }
 0x2f1   : > { %1430 = vsyncadd (!%p1320_p2), %s992_s8, 4294966272  ;;  %p17_p3 = scmp.ge.s32.totalorder %s1516_s30, 4   ;;  %s1761_s24 = smov %s1437_s25 }
 0x2f2   : > { %s1762_s25 = smov %s1441_s26  ;;  %s1763_s26 = smov %s1527_s10 }
 0x2f3   : > { %s1764_s27 = smov %s1516_s30  ;;  %19 = sbr.rel (!%p17_p3) target bundleno = 3 (0x3), region = 83 }
 0x2fa   :  { %997 = vsyncpa [#allocation4], 1 }
 0x2fb   :  { %999 = vsyncpa [#allocation4 + $0x1], 1 }

</bundles_post_ra>
